<compile_context>
chip_gen: v7x
topology: tpu7x:2x2x1
jax: 0.10.0
libtpu: 0.0.40
codegen_flags: <defaults>
</compile_context>

<pallas_src>
import jax
import jax.numpy as jnp
import numpy as np
from jax.experimental import pallas as pl
from jax.experimental.pallas import tpu as pltpu


def make_coxnam_kernel(num_hidden: int, d_is_one: bool):
    """One grid step = all feature networks applied to one batch tile."""

    def kernel(x_ref, *refs):
        out_ref = refs[-1]
        wb = refs[:-1]                 # w0, b0, w1, b1, ..., wL, bL (VMEM-resident)

        x = x_ref[...].astype(jnp.float32)

        # ---- layer 0: input_dim -> H1 (VPU broadcast-multiply, no MXU) ----
        w0 = wb[0][...]
        b0 = wb[1][...]
        if d_is_one:
            # x: (TB, F), w0: (F, H1), b0: (F, H1)
            h = x[:, :, None] * w0[None, :, :] + b0[None, :, :]
        else:
            # x: (TB, F, D), w0: (F, H1, D) pre-transposed -> lane reduction over D
            h = jnp.sum(x[:, :, None, :] * w0[None, :, :, :], axis=-1)
            h = h + b0[None, :, :]
        h = jnp.maximum(h, 0.0)                             # (TB, F, H1)

        # ---- hidden -> hidden layers: broadcast-multiply + lane reduce ----
        for l in range(1, num_hidden):
            w = wb[2 * l][...]                              # (F, H_out, H_in)
            b = wb[2 * l + 1][...]                          # (F, H_out)
            h = jnp.sum(h[:, :, None, :] * w[None, :, :, :], axis=-1)
            h = jnp.maximum(h + b[None, :, :], 0.0)         # (TB, F, H_out)

        # ---- final layer: H_last -> 1 is just a lane reduction ----
        wl = wb[2 * num_hidden][...]                        # (F, H_last)
        bl = wb[2 * num_hidden + 1][...]                    # (1, F)
        contrib = jnp.sum(h * wl[None, :, :], axis=-1) + bl  # (TB, F)

        # ---- risk score: sum over features (lane reduce), single store ----
        out_ref[...] = jnp.sum(contrib, axis=-1, keepdims=True).astype(out_ref.dtype)

    return kernel


def _const_index_map(ndim):
    return lambda i: (0,) * ndim


def coxnam_forward(x, params, *, batch_tile=None):
    """x: (B, F) or (B, F, D); params: list of (W_l (F, in, out), b_l (F, 1, out))."""
    if x.ndim == 3 and x.shape[-1] == 1:
        x = x[..., 0]                                       # treat as D == 1 path
    d_is_one = (x.ndim == 2)
    if d_is_one:
        B, F = x.shape
    else:
        B, F, _ = x.shape

    num_hidden = len(params) - 1

    # Re-layout the stacked weights once so every in-kernel reduction is a lane reduce
    # and all weight blocks are small, fully VMEM-resident 2-D/3-D tiles.
    flat_args, w_specs = [], []
    for l, (w, b) in enumerate(params):
        if l == 0:
            wk = w[:, 0, :] if d_is_one else jnp.transpose(w, (0, 2, 1))
            bk = b[:, 0, :]                                 # (F, H1)
        elif l < num_hidden:
            wk = jnp.transpose(w, (0, 2, 1))                # (F, H_out, H_in)
            bk = b[:, 0, :]                                 # (F, H_out)
        else:
            wk = w[:, :, 0]                                 # (F, H_last)
            bk = b[:, 0, :].reshape(1, F)                   # (1, F)
        for a in (wk, bk):
            flat_args.append(a)
            w_specs.append(pl.BlockSpec(a.shape, _const_index_map(a.ndim)))

    # Batch tiling: one lane-dense tile per grid step; "parallel" lets v7x's two
    # TensorCores split the batch.  Small batches collapse to a single grid step.
    TB = batch_tile if batch_tile is not None else min(B, 256)
    n_tiles = (B + TB - 1) // TB
    B_pad = n_tiles * TB
    if B_pad != B:
        x = jnp.pad(x, [(0, B_pad - B)] + [(0, 0)] * (x.ndim - 1))

    if d_is_one:
        x_spec = pl.BlockSpec((TB, F), lambda i: (i, 0))
    else:
        x_spec = pl.BlockSpec((TB, F, x.shape[-1]), lambda i: (i, 0, 0))

    out = pl.pallas_call(
        make_coxnam_kernel(num_hidden, d_is_one),
        out_shape=jax.ShapeDtypeStruct((B_pad, 1), jnp.float32),
        grid=(n_tiles,),
        in_specs=[x_spec] + w_specs,
        out_specs=pl.BlockSpec((TB, 1), lambda i: (i, 0)),
        compiler_params=pltpu.CompilerParams(
            dimension_semantics=("parallel",)),
    )(x, *flat_args)
    return out[:B]                                          # (B, 1) risk scores


def coxnam_reference(x, params):
    """Pure-JAX reference matching the PyTorch forward."""
    if x.ndim == 2:
        x = x[..., None]
    h = x.astype(jnp.float32)                               # (B, F, D)
    for l, (w, b) in enumerate(params):
        h = jnp.einsum("bfi,fio->bfo", h, w) + b[None, :, 0, :]
        if l < len(params) - 1:
            h = jnp.maximum(h, 0.0)
    return jnp.sum(h, axis=1)                               # (B, 1)


def init_params(key, num_features, input_dim, hidden_units):
    """nn.Linear-style U(-1/sqrt(fan_in), 1/sqrt(fan_in)) init, stacked over features."""
    dims = [input_dim] + list(hidden_units) + [1]
    params = []
    for l in range(len(dims) - 1):
        fan_in, fan_out = dims[l], dims[l + 1]
        key, kw, kb = jax.random.split(key, 3)
        bound = 1.0 / np.sqrt(fan_in)
        w = jax.random.uniform(kw, (num_features, fan_in, fan_out),
                               jnp.float32, -bound, bound)
        b = jax.random.uniform(kb, (num_features, 1, fan_out),
                               jnp.float32, -bound, bound)
        params.append((w, b))
    return params


if __name__ == "__main__":
    key = jax.random.PRNGKey(0)

    # --- 2-D input path (each feature is a scalar, input_dim = 1) ---
    B, NUM_FEATURES, INPUT_DIM = 8, 4, 1
    HIDDEN_UNITS = [32, 16]
    key, kx, kp = jax.random.split(key, 3)
    x = jax.random.normal(kx, (B, NUM_FEATURES), jnp.float32)
    params = init_params(kp, NUM_FEATURES, INPUT_DIM, HIDDEN_UNITS)

    risk = coxnam_forward(x, params)
    jax.block_until_ready(risk)
    assert risk.shape == (B, 1), risk.shape
    np.testing.assert_allclose(np.asarray(risk),
                               np.asarray(coxnam_reference(x, params)),
                               rtol=1e-5, atol=1e-5)

    # --- 3-D input path (input_dim > 1) ---
    B2, F2, D2 = 8, 3, 5
    HIDDEN2 = [16, 8]
    key, kx2, kp2 = jax.random.split(key, 3)
    x2 = jax.random.normal(kx2, (B2, F2, D2), jnp.float32)
    params2 = init_params(kp2, F2, D2, HIDDEN2)

    risk2 = coxnam_forward(x2, params2)
    jax.block_until_ready(risk2)
    assert risk2.shape == (B2, 1), risk2.shape
    np.testing.assert_allclose(np.asarray(risk2),
                               np.asarray(coxnam_reference(x2, params2)),
                               rtol=1e-5, atol=1e-5)

    print("KERNEL_OK")
</pallas_src>

<mosaic_0001>
module attributes {stable_mosaic.version = 11 : i64} {
  func.func @kernel(%arg0: i32, %arg1: memref<8x4xf32, #tpu.memory_space<vmem>>, %arg2: memref<4x32xf32, #tpu.memory_space<vmem>>, %arg3: memref<4x32xf32, #tpu.memory_space<vmem>>, %arg4: memref<4x16x32xf32, #tpu.memory_space<vmem>>, %arg5: memref<4x16xf32, #tpu.memory_space<vmem>>, %arg6: memref<4x16xf32, #tpu.memory_space<vmem>>, %arg7: memref<1x4xf32, #tpu.memory_space<vmem>>, %arg8: memref<8x1xf32, #tpu.memory_space<vmem>>) attributes {dimension_semantics = [#tpu.dimension_semantics<parallel>], iteration_bounds = array<i64: 1>, scalar_prefetch = 0 : i64, scratch_operands = 0 : i64, tpu.core_type = #tpu.core_type<tc>, window_params = [{transform_indices = @transform_0, window_bounds = array<i64: 8, 4>}, {pipeline_mode = #tpu.pipeline_mode<synchronous>, transform_indices = @transform_1, window_bounds = array<i64: 4, 32>}, {pipeline_mode = #tpu.pipeline_mode<synchronous>, transform_indices = @transform_2, window_bounds = array<i64: 4, 32>}, {pipeline_mode = #tpu.pipeline_mode<synchronous>, transform_indices = @transform_3, window_bounds = array<i64: 4, 16, 32>}, {pipeline_mode = #tpu.pipeline_mode<synchronous>, transform_indices = @transform_4, window_bounds = array<i64: 4, 16>}, {pipeline_mode = #tpu.pipeline_mode<synchronous>, transform_indices = @transform_5, window_bounds = array<i64: 4, 16>}, {pipeline_mode = #tpu.pipeline_mode<synchronous>, transform_indices = @transform_6, window_bounds = array<i64: 1, 4>}, {transform_indices = @transform_7, window_bounds = array<i64: 8, 1>}]} {
    %c0 = arith.constant 0 : index
    %c0_0 = arith.constant 0 : index
    %0 = vector.load %arg1[%c0, %c0_0] : memref<8x4xf32, #tpu.memory_space<vmem>>, vector<8x4xf32>
    %c0_1 = arith.constant 0 : index
    %c0_2 = arith.constant 0 : index
    %1 = vector.load %arg2[%c0_1, %c0_2] : memref<4x32xf32, #tpu.memory_space<vmem>>, vector<4x32xf32>
    %c0_3 = arith.constant 0 : index
    %c0_4 = arith.constant 0 : index
    %2 = vector.load %arg3[%c0_3, %c0_4] : memref<4x32xf32, #tpu.memory_space<vmem>>, vector<4x32xf32>
    %3 = vector.shape_cast %0 : vector<8x4xf32> to vector<8x4x1xf32>
    %4 = vector.shape_cast %1 : vector<4x32xf32> to vector<1x4x32xf32>
    %5 = vector.broadcast %3 : vector<8x4x1xf32> to vector<8x4x32xf32>
    %6 = vector.broadcast %4 : vector<1x4x32xf32> to vector<8x4x32xf32>
    %7 = arith.mulf %5, %6 : vector<8x4x32xf32>
    %8 = vector.shape_cast %2 : vector<4x32xf32> to vector<1x4x32xf32>
    %9 = vector.broadcast %8 : vector<1x4x32xf32> to vector<8x4x32xf32>
    %10 = arith.addf %7, %9 : vector<8x4x32xf32>
    %cst = arith.constant 0.000000e+00 : f32
    %11 = vector.broadcast %cst : f32 to vector<8x4x32xf32>
    %12 = arith.maximumf %10, %11 : vector<8x4x32xf32>
    %c0_5 = arith.constant 0 : index
    %c0_6 = arith.constant 0 : index
    %c0_7 = arith.constant 0 : index
    %13 = vector.load %arg4[%c0_5, %c0_6, %c0_7] : memref<4x16x32xf32, #tpu.memory_space<vmem>>, vector<4x16x32xf32>
    %c0_8 = arith.constant 0 : index
    %c0_9 = arith.constant 0 : index
    %14 = vector.load %arg5[%c0_8, %c0_9] : memref<4x16xf32, #tpu.memory_space<vmem>>, vector<4x16xf32>
    %15 = vector.shape_cast %12 : vector<8x4x32xf32> to vector<8x4x1x32xf32>
    %16 = vector.shape_cast %13 : vector<4x16x32xf32> to vector<1x4x16x32xf32>
    %17 = vector.broadcast %15 : vector<8x4x1x32xf32> to vector<8x4x16x32xf32>
    %18 = vector.broadcast %16 : vector<1x4x16x32xf32> to vector<8x4x16x32xf32>
    %19 = arith.mulf %17, %18 : vector<8x4x16x32xf32>
    %cst_10 = arith.constant dense<0.000000e+00> : vector<8x4x16xf32>
    %20 = vector.multi_reduction <add>, %19, %cst_10 [3] : vector<8x4x16x32xf32> to vector<8x4x16xf32>
    %21 = vector.shape_cast %14 : vector<4x16xf32> to vector<1x4x16xf32>
    %22 = vector.broadcast %21 : vector<1x4x16xf32> to vector<8x4x16xf32>
    %23 = arith.addf %20, %22 : vector<8x4x16xf32>
    %cst_11 = arith.constant 0.000000e+00 : f32
    %24 = vector.broadcast %cst_11 : f32 to vector<8x4x16xf32>
    %25 = arith.maximumf %23, %24 : vector<8x4x16xf32>
    %c0_12 = arith.constant 0 : index
    %c0_13 = arith.constant 0 : index
    %26 = vector.load %arg6[%c0_12, %c0_13] : memref<4x16xf32, #tpu.memory_space<vmem>>, vector<4x16xf32>
    %c0_14 = arith.constant 0 : index
    %c0_15 = arith.constant 0 : index
    %27 = vector.load %arg7[%c0_14, %c0_15] : memref<1x4xf32, #tpu.memory_space<vmem>>, vector<1x4xf32>
    %28 = vector.shape_cast %26 : vector<4x16xf32> to vector<1x4x16xf32>
    %29 = vector.broadcast %28 : vector<1x4x16xf32> to vector<8x4x16xf32>
    %30 = arith.mulf %25, %29 : vector<8x4x16xf32>
    %cst_16 = arith.constant dense<0.000000e+00> : vector<8x4xf32>
    %31 = vector.multi_reduction <add>, %30, %cst_16 [2] : vector<8x4x16xf32> to vector<8x4xf32>
    %32 = vector.broadcast %27 : vector<1x4xf32> to vector<8x4xf32>
    %33 = arith.addf %31, %32 : vector<8x4xf32>
    %cst_17 = arith.constant dense<0.000000e+00> : vector<8xf32>
    %34 = vector.multi_reduction <add>, %33, %cst_17 [1] : vector<8x4xf32> to vector<8xf32>
    %35 = vector.shape_cast %34 : vector<8xf32> to vector<8x1xf32>
    %c0_18 = arith.constant 0 : index
    %c0_19 = arith.constant 0 : index
    %36 = vector.load %arg8[%c0_18, %c0_19] : memref<8x1xf32, #tpu.memory_space<vmem>>, vector<8x1xf32>
    tpu.vector_store %arg8[%c0_18, %c0_19], %35 {strides = array<i32>} : memref<8x1xf32, #tpu.memory_space<vmem>>, vector<8x1xf32>,
    return
  }
  func.func @transform_0(%arg0: i32) -> (i32, i32) {
    %c0_i32 = arith.constant 0 : i32
    %c0_i32_0 = arith.constant 0 : i32
    return %arg0, %c0_i32 : i32, i32
  }
  func.func @transform_1(%arg0: i32) -> (i32, i32) {
    %c0_i32 = arith.constant 0 : i32
    %c0_i32_0 = arith.constant 0 : i32
    %c0_i32_1 = arith.constant 0 : i32
    return %c0_i32, %c0_i32_0 : i32, i32
  }
  func.func @transform_2(%arg0: i32) -> (i32, i32) {
    %c0_i32 = arith.constant 0 : i32
    %c0_i32_0 = arith.constant 0 : i32
    %c0_i32_1 = arith.constant 0 : i32
    return %c0_i32, %c0_i32_0 : i32, i32
  }
  func.func @transform_3(%arg0: i32) -> (i32, i32, i32) {
    %c0_i32 = arith.constant 0 : i32
    %c0_i32_0 = arith.constant 0 : i32
    %c0_i32_1 = arith.constant 0 : i32
    %c0_i32_2 = arith.constant 0 : i32
    return %c0_i32, %c0_i32_0, %c0_i32_1 : i32, i32, i32
  }
  func.func @transform_4(%arg0: i32) -> (i32, i32) {
    %c0_i32 = arith.constant 0 : i32
    %c0_i32_0 = arith.constant 0 : i32
    %c0_i32_1 = arith.constant 0 : i32
    return %c0_i32, %c0_i32_0 : i32, i32
  }
  func.func @transform_5(%arg0: i32) -> (i32, i32) {
    %c0_i32 = arith.constant 0 : i32
    %c0_i32_0 = arith.constant 0 : i32
    %c0_i32_1 = arith.constant 0 : i32
    return %c0_i32, %c0_i32_0 : i32, i32
  }
  func.func @transform_6(%arg0: i32) -> (i32, i32) {
    %c0_i32 = arith.constant 0 : i32
    %c0_i32_0 = arith.constant 0 : i32
    %c0_i32_1 = arith.constant 0 : i32
    return %c0_i32, %c0_i32_0 : i32, i32
  }
  func.func @transform_7(%arg0: i32) -> (i32, i32) {
    %c0_i32 = arith.constant 0 : i32
    %c0_i32_0 = arith.constant 0 : i32
    return %arg0, %c0_i32 : i32, i32
  }
}

</mosaic_0001>

<bundles_post_ra>
// kernel: tpu_custom_call.1
= control target key start
LH: loop header
LB: loop body
LE: loop exit
PB: predicated region body
PF: predicated region fallthrough
CT: control target
= control target key end

     0   :  { %12 = vsyncpa [#allocation3], 0  ;;  %s1793_s24 = smov [#allocation2]   ;;  %s2865_s0 = inlined_call_operand.vmem [shape: f32[8,4], index: 0, kind: input, shape index: {}]   ;;  %s2866_s1 = inlined_call_operand.vmem [shape: f32[4,32], index: 1, kind: input, shape index: {}]   ;;  %s2867_s2 = inlined_call_operand.vmem [shape: f32[4,32], index: 2, kind: input, shape index: {}]   ;;  %s2868_s3 = inlined_call_operand.hbm [shape: f32[4,16,32], index: 3, kind: input, shape index: {}]   ;;  %s2869_s4 = inlined_call_operand.vmem [shape: f32[4,16], index: 4, kind: input, shape index: {}]   ;;  %s2870_s5 = inlined_call_operand.vmem [shape: f32[4,16], index: 5, kind: input, shape index: {}]   ;;  %s2871_s6 = inlined_call_operand.vmem [shape: f32[1,4], index: 6, kind: input, shape index: {}]   ;;  %s2872_s7 = inlined_call_operand.vmem [shape: f32[8,1], index: 7, kind: output, shape index: {}]  }
   0x1   :  { %s24_s25 = sshll.u32 %s1793_s24, 4  ;;  %s1769_s28 = scalar_lea.hbm %s2868_s3, 1024  ;;  %s25_s25 = int_to_ptr.vmem [resolvable:$true] %s24_s25 }
   0x2   :  { %p1770_p0 = scmp.ne.s32.totalorder %s2868_s3, %s1769_s28  ;;  %p1773_p1 = scmp.lt.u32.totalorder %s1769_s28, %s2868_s3 }
   0x4   :  { %p1775_p2 = pnand %p1773_p1, %p1770_p0 }
   0x6   :  { %1778 = shalt.err (!%p1775_p2)
}
   0x7   :  { %s1779_s10 = scalar_lea.vmem %s25_s25, 1024  ;;  %p1784_p4 = scmp.lt.s32.totalorder %s25_s25, %s25_s25 }
   0x8   :  { %p1780_p3 = scmp.ne.s32.totalorder %s25_s25, %s1779_s10  ;;  %p1785_p5 = scmp.lt.s32.totalorder %s1779_s10, %s1779_s10 }
   0xa   :  { %p1786_p6 = por %p1785_p5, %p1784_p4 }
   0xc   :  { %p1787_p7 = pnand %p1786_p6, %p1780_p3 }
   0xe   :  { %1790 = shalt.err (!%p1787_p7)
}
   0xf   :  { %s1794_s11 = smov 128   ;;  %s1795_s12 = smov 8  }
  0x10   :  { %30 = dma.hbm_to_vmem [thread:$0]  %s2868_s3, 1024, %s25_s25, [#allocation3], %s1794_s11, %s1794_s11, %s1795_s12  }
  0x11   :  { %1791 = dma.done.wait [#allocation3], 1024  }
  0x12   :  { %1792 = vsyncadd [#allocation3], 4294966272  ;;  %v2873_v0 = vlaneseq  ;;  %v40_v6 = vld [vmem:[%s2865_s0] sm:$0xff]  ;;  %v1796_v19 = vmov 1966171168   ;;  %v1916_v50 = vld [vmem:[#allocation2 + $0x8] sm:$0xff] }
  0x13   :  { %v141_v20 = vunpack.c.l.s4 %v1796_v19  ;;  %v1879_v21 = vld [vmem:[%s2866_s1] sm:$0xf]  ;;  %vm556_vm0 = vcmask 261120   ;;  %vm1316_vm1 = vcmask 130112   ;;  %vm1597_vm2 = vcmask 1041409  }
  0x14   :  { %v1851_v1 = vshrl.u32 %v2873_v0, 7  ;;  %v1884_v23 = vld [vmem:[%s2867_s2] sm:$0xf]  ;;  %vm1599_vm3 = vcmask 1042434   ;;  %vm1601_vm4 = vcmask 1043459   ;;  %vm1632_vm5 = vcmask 125952  }
  0x15   :  { %v142_v22 = vunpack.c.0.s8 %v141_v20  ;;  %v1918_v51 = vld [vmem:[#allocation2] sm:$0xff]  ;;  %vm1741_vm6 = vcmask 1044484   ;;  %vm1743_vm7 = vcmask 1045509   ;;  %vm1745_vm8 = vcmask 1046534  }
  0x16   :  { %2876 = vst [vmem:[#allocation5_spill] sm:$0xff] %v1851_v1  ;;  %v1854_v2 = vsub.s32 0, %v1851_v1  ;;  %v1857_v3 = vsub.s32 2, %v1851_v1  ;;  %v1860_v4 = vsub.s32 1, %v1851_v1  ;;  %v1863_v5 = vsub.s32 3, %v1851_v1 }
  0x17   :  { %v73_v11 = vsub.s32 4, %v1851_v1  ;;  %v80_v12 = vsub.s32 5, %v1851_v1  ;;  %v87_v15 = vsub.s32 6, %v1851_v1  ;;  %v94_v16 = vsub.s32 7, %v1851_v1 }
  0x18   :  { %v46_v7 = vrot.slane %v40_v6, %v1854_v2  ;;  %v60_v8 = vrot.slane %v40_v6, %v1857_v3  ;;  %v53_v9 = vrot.slane %v40_v6, %v1860_v4  ;;  %v67_v10 = vrot.slane %v40_v6, %v1863_v5 }
  0x19   :  { %v74_v13 = vrot.slane %v40_v6, %v73_v11  ;;  %v81_v14 = vrot.slane %v40_v6, %v80_v12  ;;  %v88_v17 = vrot.slane %v40_v6, %v87_v15  ;;  %v95_v18 = vrot.slane %v40_v6, %v94_v16 }
  0x1a   :  { %48 = vbcast.lane.b32.xlu0 %v46_v7, 256  ;;  %62 = vbcast.lane.b32.xlu1 %v60_v8, 256  ;;  %v1889_v28 = vsub.s32 %v142_v22, %v1851_v1  ;;  %vm1747_vm9 = vcmask 1047559   ;;  %vm1750_vm10 = vcmask 31744   ;;  %vm1754_vm11 = vcmask 7168  }
  0x1e   :  { %55 = vbcast.lane.b32.xlu0 %v53_v9, 256  ;;  %69 = vbcast.lane.b32.xlu1 %v67_v10, 256 }
  0x22   :  { %76 = vbcast.lane.b32.xlu0 %v74_v13, 256  ;;  %83 = vbcast.lane.b32.xlu1 %v81_v14, 256 }
  0x26   :  { %90 = vbcast.lane.b32.xlu0 %v88_v17, 256  ;;  %97 = vbcast.lane.b32.xlu1 %v95_v18, 256 }
  0x8c   :  { %v49_v24 = vpop.permute.xlu0 %48  ;;  %v63_v25 = vpop.permute.xlu1 %62 }
  0x8d   :  { %v99_v26 = vmul.f32 %v49_v24, %v1879_v21  ;;  %v101_v27 = vmul.f32 %v63_v25, %v1879_v21 }
  0x8f   :  { %v107_v29 = vadd.f32 %v99_v26, %v1884_v23  ;;  %v109_v30 = vadd.f32 %v101_v27, %v1884_v23 }
  0x90   :  { %v56_v31 = vpop.permute.xlu0 %55  ;;  %v70_v32 = vpop.permute.xlu1 %69 }
  0x91   :  { %v115_v33 = vmax.f32 %v107_v29, 0.0  ;;  %v100_v34 = vmul.f32 %v56_v31, %v1879_v21  ;;  %v117_v35 = vmax.f32 %v109_v30, 0.0  ;;  %v102_v36 = vmul.f32 %v70_v32, %v1879_v21 }
  0x93   :  { %v1896_v37 = vrot.slane %v115_v33, %v1889_v28  ;;  %v108_v38 = vadd.f32 %v100_v34, %v1884_v23  ;;  %v1900_v39 = vrot.slane %v117_v35, %v1889_v28  ;;  %v110_v40 = vadd.f32 %v102_v36, %v1884_v23 }
  0x94   :  { %v77_v41 = vpop.permute.xlu0 %76  ;;  %v84_v42 = vpop.permute.xlu1 %83 }
  0x95   :  { %v116_v43 = vmax.f32 %v108_v38, 0.0  ;;  %v118_v44 = vmax.f32 %v110_v40, 0.0  ;;  %v1905_v45 = vrot.slane %v1896_v37, %v1889_v28  ;;  %v103_v46 = vmul.f32 %v77_v41, %v1879_v21 }
  0x96   :  { %v104_v47 = vmul.f32 %v84_v42, %v1879_v21  ;;  %v1911_v48 = vrot.slane %v1900_v39, %v1889_v28  ;;  %v147_v32 = vcombine.high %v1896_v37, %v1896_v37 }
  0x97   :  { %v1914_v49 = vrot.slane %v116_v43, %v1889_v28  ;;  %v335_v52 = vrot.slane %v1905_v45, %v1854_v2  ;;  %v111_v53 = vadd.f32 %v103_v46, %v1884_v23  ;;  %v1927_v57 = vrot.slane %v118_v44, %v1889_v28 }
  0x98   :  { %v112_v54 = vadd.f32 %v104_v47, %v1884_v23  ;;  %v367_v55 = vrot.slane %v1911_v48, %v1854_v2  ;;  %v91_v56 = vpop.permute.xlu0 %90  ;;  %v1984_v41 = vrot.slane %v147_v32, %v1889_v28 }
  0x99   :  { %v1931_v58 = vrot.slane %v1914_v49, %v1889_v28  ;;  %v105_v59 = vmul.f32 %v91_v56, %v1879_v21  ;;  %v493_v60 = vmul.f32 %v335_v52, %v1916_v50  ;;  %v492_v61 = vmul.f32 %v335_v52, %v1918_v51 }
  0x9a   :  { %v119_v62 = vmax.f32 %v111_v53, 0.0  ;;  %v120_v63 = vmax.f32 %v112_v54, 0.0  ;;  %v509_v11 = vmul.f32 %v367_v55, %v1916_v50  ;;  %v508_v15 = vmul.f32 %v367_v55, %v1918_v51 }
  0x9b   :  { %v351_v6 = vrot.slane %v1931_v58, %v1854_v2  ;;  %v113_v7 = vadd.f32 %v105_v59, %v1884_v23  ;;  %v560_v8 = vsel %vm556_vm0, %v493_v60, 0.0  ;;  %v557_v9 = vsel %vm556_vm0, %v492_v61, 0.0  ;;  %v2001_v61 = vld [vmem:[#allocation2 + $0x10] sm:$0xff] }
  0x9c   :  { %v1942_v10 = vrot.slane %v119_v62, %v1889_v28  ;;  %561 = vadd.xlane.f32.xlu1 %v560_v8  ;;  %558 = vadd.xlane.f32.xlu0 %v557_v9  ;;  %v266_v12 = vrot.slane %v120_v63, %v1889_v28  ;;  %v1951_v17 = vrot.slane %v1927_v57, %v1889_v28  ;;  %v608_v24 = vsel %vm556_vm0, %v509_v11, 0.0 }
  0x9d   :  { %v501_v13 = vmul.f32 %v351_v6, %v1916_v50  ;;  %v500_v14 = vmul.f32 %v351_v6, %v1918_v51  ;;  %v121_v16 = vmax.f32 %v113_v7, 0.0  ;;  %v605_v27 = vsel %vm556_vm0, %v508_v15, 0.0  ;;  %v2012_v7 = vld [vmem:[#allocation2 + $0x20] sm:$0xff] }
  0x9e   :  { %v1957_v20 = vrot.slane %v1942_v10, %v1889_v28  ;;  %v383_v22 = vrot.slane %v1951_v17, %v1854_v2  ;;  %v1964_v26 = vrot.slane %v266_v12, %v1889_v28  ;;  %v267_v47 = vcombine.high %v266_v12, %v266_v12  ;;  %v2017_v12 = vld [vmem:[#allocation2 + $0x18] sm:$0xff] }
  0x9f   :  { %v584_v18 = vsel %vm556_vm0, %v501_v13, 0.0  ;;  %v581_v19 = vsel %vm556_vm0, %v500_v14, 0.0  ;;  %v290_v25 = vrot.slane %v121_v16, %v1889_v28  ;;  %v171_v52 = vcombine.high %v1914_v49, %v1914_v49 }
  0xa0   :  { %585 = vadd.xlane.f32.xlu0 %v584_v18  ;;  %582 = vadd.xlane.f32.xlu1 %v581_v19  ;;  %v517_v29 = vmul.f32 %v383_v22, %v1916_v50  ;;  %v516_v30 = vmul.f32 %v383_v22, %v1918_v51  ;;  %v399_v31 = vrot.slane %v1957_v20, %v1854_v2  ;;  %v98_v18 = vpop.permute.xlu1 %97 }
  0xa1   :  { %v415_v33 = vrot.slane %v1964_v26, %v1854_v2  ;;  %v1976_v34 = vrot.slane %v290_v25, %v1889_v28  ;;  %v162_v53 = vcombine.high %v1905_v45, %v1905_v45  ;;  %v339_v54 = vrot.slane %v1984_v41, %v1854_v2 }
  0xa2   :  { %v632_v35 = vsel %vm556_vm0, %v517_v29, 0.0  ;;  %v629_v36 = vsel %vm556_vm0, %v516_v30, 0.0  ;;  %v525_v38 = vmul.f32 %v399_v31, %v1916_v50  ;;  %v524_v40 = vmul.f32 %v399_v31, %v1918_v51  ;;  %v2040_v30 = vld [vmem:[#allocation2 + $0x28] sm:$0xff] }
  0xa3   :  { %v533_v37 = vmul.f32 %v415_v33, %v1916_v50  ;;  %v532_v44 = vmul.f32 %v415_v33, %v1918_v51  ;;  %v431_v46 = vrot.slane %v1976_v34, %v1854_v2  ;;  %v2004_v49 = vrot.slane %v267_v47, %v1889_v28 }
  0xa4   :  { %609 = vadd.xlane.f32.xlu0 %v608_v24  ;;  %606 = vadd.xlane.f32.xlu1 %v605_v27  ;;  %v656_v42 = vsel %vm556_vm0, %v525_v38, 0.0  ;;  %v653_v43 = vsel %vm556_vm0, %v524_v40, 0.0  ;;  %v195_v45 = vcombine.high %v1900_v39, %v1900_v39  ;;  %v343_v62 = vrot.slane %v162_v53, %v1854_v2 }
  0xa5   :  { %v680_v55 = vsel %vm556_vm0, %v533_v37, 0.0  ;;  %v677_v56 = vsel %vm556_vm0, %v532_v44, 0.0  ;;  %v541_v59 = vmul.f32 %v431_v46, %v1916_v50  ;;  %v540_v60 = vmul.f32 %v431_v46, %v1918_v51 }
  0xa6   :  { %v2010_v63 = vrot.slane %v171_v52, %v1889_v28  ;;  %v291_v6 = vcombine.high %v290_v25, %v290_v25  ;;  %v494_v11 = vmul.f32 %v339_v54, %v2001_v61  ;;  %v419_v39 = vrot.slane %v2004_v49, %v1854_v2 }
  0xa7   :  { %v704_v8 = vsel %vm556_vm0, %v541_v59, 0.0  ;;  %v701_v9 = vsel %vm556_vm0, %v540_v60, 0.0  ;;  %v496_v13 = vmul.f32 %v343_v62, %v2012_v7  ;;  %v186_v15 = vcombine.high %v1931_v58, %v1931_v58 }
  0xa8   :  { %633 = vadd.xlane.f32.xlu0 %v632_v35  ;;  %630 = vadd.xlane.f32.xlu1 %v629_v36  ;;  %v355_v14 = vrot.slane %v2010_v63, %v1854_v2  ;;  %v2027_v16 = vrot.slane %v195_v45, %v1889_v28  ;;  %v534_v19 = vmul.f32 %v419_v39, %v2001_v61  ;;  %v563_v27 = vsel %vm556_vm0, %v494_v11, 0.0 }
  0xa9   :  { %v535_v22 = vmul.f32 %v419_v39, %v2017_v12  ;;  %v2032_v24 = vrot.slane %v291_v6, %v1889_v28  ;;  %v219_v25 = vcombine.high %v1927_v57, %v1927_v57  ;;  %v495_v58 = vmul.f32 %v339_v54, %v2017_v12 }
  0xaa   :  { %v210_v29 = vcombine.high %v1911_v48, %v1911_v48  ;;  %v2043_v31 = vsel %vm556_vm0, %v534_v19, 0.0  ;;  %v106_v57 = vmul.f32 %v98_v18, %v1879_v21  ;;  %v569_v35 = vsel %vm556_vm0, %v496_v13, 0.0 }
  0xab   :  { %v2046_v32 = vsel %vm556_vm0, %v535_v22, 0.0  ;;  %v435_v33 = vrot.slane %v2032_v24, %v1854_v2  ;;  %v502_v36 = vmul.f32 %v355_v14, %v2001_v61  ;;  %v359_v38 = vrot.slane %v186_v15, %v1854_v2  ;;  %v2102_v22 = vld [vmem:[#allocation2 + $0x30] sm:$0xff] }
  0xac   :  { %657 = vadd.xlane.f32.xlu0 %v656_v42  ;;  %654 = vadd.xlane.f32.xlu1 %v653_v43  ;;  %v371_v48 = vrot.slane %v2027_v16, %v1854_v2  ;;  %v114_v37 = vadd.f32 %v106_v57, %v1884_v23  ;;  %v243_v42 = vcombine.high %v1942_v10, %v1942_v10  ;;  %v566_v21 = vsel %vm556_vm0, %v495_v58, 0.0 }
  0xad   :  { %v542_v40 = vmul.f32 %v435_v33, %v2001_v61  ;;  %v497_v43 = vmul.f32 %v343_v62, %v2040_v30  ;;  %v503_v44 = vmul.f32 %v355_v14, %v2017_v12  ;;  %v375_v46 = vrot.slane %v210_v29, %v1854_v2 }
  0xae   :  { %v122_v52 = vmax.f32 %v114_v37, 0.0  ;;  %v587_v53 = vsel %vm556_vm0, %v502_v36, 0.0  ;;  %v504_v54 = vmul.f32 %v359_v38, %v2012_v7  ;;  %v510_v23 = vmul.f32 %v371_v48, %v2001_v61 }
  0xaf   :  { %v2065_v47 = vsel %vm556_vm0, %v542_v40, 0.0  ;;  %v2071_v10 = vrot.slane %v219_v25, %v1889_v28  ;;  %v234_v59 = vcombine.high %v1951_v17, %v1951_v17  ;;  %v2078_v60 = vrot.slane %v243_v42, %v1889_v28  ;;  %v2104_v25 = vld [vmem:[#allocation2 + $0x38] sm:$0xff] }
  0xb0   :  { %681 = vadd.xlane.f32.xlu0 %v680_v55  ;;  %678 = vadd.xlane.f32.xlu1 %v677_v56  ;;  %v505_v55 = vmul.f32 %v359_v38, %v2040_v30  ;;  %v314_v56 = vrot.slane %v122_v52, %v1889_v28  ;;  %v572_v45 = vsel %vm556_vm0, %v497_v43, 0.0  ;;  %v590_v62 = vsel %vm556_vm0, %v503_v44, 0.0 }
  0xb1   :  { %v512_v6 = vmul.f32 %v375_v46, %v2012_v7  ;;  %v611_v11 = vsel %vm556_vm0, %v510_v23, 0.0  ;;  %v511_v39 = vmul.f32 %v371_v48, %v2017_v12  ;;  %v2090_v17 = vrot.slane %v2071_v10, %v1854_v2 }
  0xb2   :  { %v596_v13 = vsel %vm556_vm0, %v505_v55, 0.0  ;;  %v513_v14 = vmul.f32 %v375_v46, %v2040_v30  ;;  %v315_v15 = vcombine.high %v314_v56, %v314_v56  ;;  %v2100_v19 = vrot.slane %v2078_v60, %v1854_v2 }
  0xb3   :  { %v543_v58 = vmul.f32 %v435_v33, %v2017_v12  ;;  %v617_v29 = vsel %vm556_vm0, %v512_v6, 0.0  ;;  %v258_v57 = vcombine.high %v1957_v20, %v1957_v20  ;;  %v307_v40 = vcombine.high %v2032_v24, %v2032_v24 }
  0xb4   :  { %705 = vadd.xlane.f32.xlu0 %v704_v8  ;;  %702 = vadd.xlane.f32.xlu1 %v701_v9  ;;  %v283_v8 = vcombine.high %v2004_v49, %v2004_v49  ;;  %v593_v9 = vsel %vm556_vm0, %v504_v54, 0.0  ;;  %v2096_v49 = vrot.slane %v234_v59, %v1854_v2  ;;  %v518_v33 = vmul.f32 %v2090_v17, %v2001_v61 }
  0xb5   :  { %v2116_v48 = vsel %vm556_vm0, %v543_v58, 0.0  ;;  %v329_v42 = vrot.slane %v315_v15, %v1889_v28  ;;  %v443_v43 = vrot.slane %v307_v40, %v1854_v2  ;;  %v614_v59 = vsel %vm556_vm0, %v511_v39, 0.0 }
  0xb6   :  { %v427_v18 = vrot.slane %v283_v8, %v1854_v2  ;;  %v520_v46 = vmul.f32 %v2096_v49, %v2012_v7 }
  0xb7   :  { %v451_v52 = vrot.slane %v329_v42, %v1854_v2  ;;  %v331_v54 = vcombine.high %v329_v42, %v329_v42 }
  0xb8   :  { %564 = vadd.xlane.f32.xlu0 %v563_v27  ;;  %570 = vadd.xlane.f32.xlu1 %v569_v35  ;;  %v306_v27 = vcombine.high %v1976_v34, %v1976_v34  ;;  %v538_v35 = vmul.f32 %v427_v18, %v2102_v22  ;;  %v539_v36 = vmul.f32 %v427_v18, %v2104_v25  ;;  %v635_v18 = vsel %vm556_vm0, %v518_v33, 0.0 }
  0xb9   :  { %v322_v34 = vrot.slane %v314_v56, %v1889_v28  ;;  %v546_v28 = vmul.f32 %v443_v43, %v2102_v22 }
  0xba   :  { %v439_v38 = vrot.slane %v306_v27, %v1854_v2  ;;  %v2124_v20 = vsel %vm556_vm0, %v538_v35, 0.0  ;;  %v2127_v37 = vsel %vm556_vm0, %v539_v36, 0.0 }
  0xbb   :  { %v447_v44 = vrot.slane %v322_v34, %v1854_v2  ;;  %v2150_v8 = vsel %vm556_vm0, %v546_v28, 0.0 }
  0xbc   :  { %567 = vadd.xlane.f32.xlu0 %v566_v21  ;;  %588 = vadd.xlane.f32.xlu1 %v587_v53  ;;  %v544_v21 = vmul.f32 %v439_v38, %v2012_v7  ;;  %v545_v24 = vmul.f32 %v439_v38, %v2040_v30  ;;  %v330_v53 = vcombine.high %v322_v34, %v322_v34  ;;  %v620_v34 = vsel %vm556_vm0, %v513_v14, 0.0 }
  0xbd   :  { %v548_v56 = vmul.f32 %v447_v44, %v1918_v51  ;;  %v549_v6 = vmul.f32 %v447_v44, %v1916_v50  ;;  %v551_v51 = vmul.f32 %v451_v52, %v2017_v12  ;;  %v459_v50 = vrot.slane %v331_v54, %v1854_v2 }
  0xbe   :  { %v2138_v23 = vsel %vm556_vm0, %v544_v21, 0.0  ;;  %v2142_v55 = vsel %vm556_vm0, %v545_v24, 0.0  ;;  %v641_v21 = vsel %vm556_vm0, %v520_v46, 0.0  ;;  %v526_v24 = vmul.f32 %v2100_v19, %v2001_v61 }
  0xbf   :  { %v2164_v15 = vsel %vm556_vm0, %v549_v6, 0.0  ;;  %v2170_v58 = vsel %vm556_vm0, %v551_v51, 0.0  ;;  %v554_v35 = vmul.f32 %v459_v50, %v2102_v22  ;;  %v555_v36 = vmul.f32 %v459_v50, %v2104_v25 }
  0xc0   :  { %573 = vadd.xlane.f32.xlu0 %v572_v45  ;;  %594 = vadd.xlane.f32.xlu1 %v593_v9  ;;  %v547_v45 = vmul.f32 %v443_v43, %v2104_v25  ;;  %v2153_v9 = vsel %vm556_vm0, %v548_v56, 0.0  ;;  %v519_v43 = vmul.f32 %v2090_v17, %v2017_v12  ;;  %v407_v44 = vrot.slane %v258_v57, %v1854_v2 }
  0xc1   :  { %v2183_v33 = vsel %vm556_vm0, %v554_v35, 0.0  ;;  %v2186_v42 = vsel %vm556_vm0, %v555_v36, 0.0  ;;  %v521_v14 = vmul.f32 %v2096_v49, %v2040_v30  ;;  %v282_v46 = vcombine.high %v1964_v26, %v1964_v26 }
  0xc2   :  { %v528_v54 = vmul.f32 %v407_v44, %v2012_v7  ;;  %v527_v57 = vmul.f32 %v2100_v19, %v2017_v12  ;;  %v529_v56 = vmul.f32 %v407_v44, %v2040_v30  ;;  %v163_v26 = vcombine.high %v1984_v41, %v1984_v41 }
  0xc3   :  { %v423_v49 = vrot.slane %v282_v46, %v1854_v2 }
  0xc4   :  { %591 = vadd.xlane.f32.xlu0 %v590_v62  ;;  %612 = vadd.xlane.f32.xlu1 %v611_v11  ;;  %v550_v62 = vmul.f32 %v451_v52, %v2001_v61  ;;  %v455_v11 = vrot.slane %v330_v53, %v1854_v2  ;;  %v638_v52 = vsel %vm556_vm0, %v519_v43, 0.0  ;;  %v659_v53 = vsel %vm556_vm0, %v526_v24, 0.0 }
  0xc5   :  { %v644_v61 = vsel %vm556_vm0, %v521_v14, 0.0  ;;  %v665_v17 = vsel %vm556_vm0, %v528_v54, 0.0  ;;  %v662_v28 = vsel %vm556_vm0, %v527_v57, 0.0  ;;  %v347_v19 = vrot.slane %v163_v26, %v1854_v2 }
  0xc6   :  { %v2161_v39 = vsel %vm556_vm0, %v550_v62, 0.0  ;;  %v552_v27 = vmul.f32 %v455_v11, %v2012_v7  ;;  %v187_v62 = vcombine.high %v2010_v63, %v2010_v63  ;;  %v537_v6 = vmul.f32 %v423_v49, %v2040_v30 }
  0xc7   :  { %v499_v51 = vmul.f32 %v347_v19, %v2104_v25 }
  0xc8   :  { %597 = vadd.xlane.f32.xlu0 %v596_v13  ;;  %618 = vadd.xlane.f32.xlu1 %v617_v29  ;;  %v2158_v13 = vsel %vm556_vm0, %v547_v45, 0.0  ;;  %v553_v29 = vmul.f32 %v455_v11, %v2040_v30  ;;  %v2176_v38 = vsel %vm556_vm0, %v552_v27, 0.0  ;;  %v668_v45 = vsel %vm556_vm0, %v529_v56, 0.0 }
  0xc9   :  { %v363_v41 = vrot.slane %v187_v62, %v1854_v2  ;;  %v692_v11 = vsel %vm556_vm0, %v537_v6, 0.0 }
  0xca   :  { %v2179_v40 = vsel %vm556_vm0, %v553_v29, 0.0 }
  0xcb   :  { %v506_v50 = vmul.f32 %v363_v41, %v2102_v22  ;;  %v507_v27 = vmul.f32 %v363_v41, %v2104_v25 }
  0xcc   :  { %615 = vadd.xlane.f32.xlu0 %v614_v59  ;;  %636 = vadd.xlane.f32.xlu1 %v635_v18  ;;  %v536_v59 = vmul.f32 %v423_v49, %v2012_v7  ;;  %v498_v7 = vmul.f32 %v347_v19, %v2102_v22  ;;  %v235_v18 = vcombine.high %v2071_v10, %v2071_v10 }
  0xcd   :  { %v602_v10 = vsel %vm556_vm0, %v507_v27, 0.0 }
  0xce   :  { %v689_v12 = vsel %vm556_vm0, %v536_v59, 0.0  ;;  %v575_v63 = vsel %vm556_vm0, %v498_v7, 0.0  ;;  %v395_v35 = vrot.slane %v235_v18, %v1854_v2 }
  0xd0   :  { %621 = vadd.xlane.f32.xlu0 %v620_v34  ;;  %642 = vadd.xlane.f32.xlu1 %v641_v21  ;;  %v522_v21 = vmul.f32 %v395_v35, %v2102_v22  ;;  %v523_v44 = vmul.f32 %v395_v35, %v2104_v25 }
  0xd2   :  { %v647_v24 = vsel %vm556_vm0, %v522_v21, 0.0 }
  0xd4   :  { %639 = vadd.xlane.f32.xlu0 %v638_v52  ;;  %660 = vadd.xlane.f32.xlu1 %v659_v53  ;;  %v650_v52 = vsel %vm556_vm0, %v523_v44, 0.0 }
  0xd8   :  { %645 = vadd.xlane.f32.xlu0 %v644_v61  ;;  %666 = vadd.xlane.f32.xlu1 %v665_v17  ;;  %v1797_v17 = vmov 0  }
  0xd9   :  { %1768 = vset.pattern.permute.xlu1 %v1797_v17  ;;  %1767 = vset.pattern.permute.xlu0 %v1797_v17 }
  0xdc   :  { %663 = vadd.xlane.f32.xlu0 %v662_v28  ;;  %684 = vadd.xlane.f32.xlu1 %v2043_v31  ;;  %v211_v31 = vcombine.high %v2027_v16, %v2027_v16  ;;  %v578_v16 = vsel %vm556_vm0, %v499_v51, 0.0 }
  0xde   :  { %v379_v30 = vrot.slane %v211_v31, %v1854_v2 }
  0xe0   :  { %669 = vadd.xlane.f32.xlu0 %v668_v45  ;;  %690 = vadd.xlane.f32.xlu1 %v689_v12  ;;  %v514_v29 = vmul.f32 %v379_v30, %v2102_v22  ;;  %v515_v36 = vmul.f32 %v379_v30, %v2104_v25 }
  0xe2   :  { %v623_v34 = vsel %vm556_vm0, %v514_v29, 0.0  ;;  %v626_v43 = vsel %vm556_vm0, %v515_v36, 0.0 }
  0xe4   :  { %687 = vadd.xlane.f32.xlu0 %v2046_v32  ;;  %708 = vadd.xlane.f32.xlu1 %v2065_v47  ;;  %v259_v32 = vcombine.high %v2078_v60, %v2078_v60  ;;  %v599_v47 = vsel %vm556_vm0, %v506_v50, 0.0 }
  0xe6   :  { %v411_v60 = vrot.slane %v259_v32, %v1854_v2 }
  0xe8   :  { %693 = vadd.xlane.f32.xlu0 %v692_v11  ;;  %576 = vadd.xlane.f32.xlu1 %v575_v63  ;;  %v530_v14 = vmul.f32 %v411_v60, %v2102_v22  ;;  %v531_v54 = vmul.f32 %v411_v60, %v2104_v25  ;;  %v131_v22 = vld [vmem:[%s2869_s4] sm:$0xf] }
  0xe9   :  { %v753_v25 = vrot.slane %v131_v22, %v1854_v2 }
  0xea   :  { %v671_v53 = vsel %vm556_vm0, %v530_v14, 0.0  ;;  %v674_v46 = vsel %vm556_vm0, %v531_v54, 0.0 }
  0xec   :  { %579 = vadd.xlane.f32.xlu0 %v578_v16  ;;  %600 = vadd.xlane.f32.xlu1 %v599_v47 }
  0xf0   :  { %603 = vadd.xlane.f32.xlu0 %v602_v10  ;;  %624 = vadd.xlane.f32.xlu1 %v623_v34 }
  0xf4   :  { %627 = vadd.xlane.f32.xlu0 %v626_v43  ;;  %648 = vadd.xlane.f32.xlu1 %v647_v24 }
  0xf8   :  { %651 = vadd.xlane.f32.xlu0 %v650_v52  ;;  %672 = vadd.xlane.f32.xlu1 %v671_v53 }
  0xfc   :  { %675 = vadd.xlane.f32.xlu0 %v674_v46  ;;  %696 = vadd.xlane.f32.xlu1 %v2124_v20 }
 0x100   :  { %699 = vadd.xlane.f32.xlu0 %v2127_v37  ;;  %714 = vadd.xlane.f32.xlu1 %v2138_v23 }
 0x104   :  { %711 = vadd.xlane.f32.xlu0 %v2116_v48  ;;  %720 = vadd.xlane.f32.xlu1 %v2150_v8  ;;  %v764_v48 = vrot.slane %v131_v22, %v1860_v4  ;;  %v775_v8 = vrot.slane %v131_v22, %v1857_v3 }
 0x108   :  { %717 = vadd.xlane.f32.xlu0 %v2142_v55  ;;  %726 = vadd.xlane.f32.xlu1 %v2153_v9 }
 0x10c   :  { %723 = vadd.xlane.f32.xlu0 %v2158_v13  ;;  %732 = vadd.xlane.f32.xlu1 %v2161_v39  ;;  %v786_v39 = vrot.slane %v131_v22, %v1863_v5 }
 0x110   :  { %729 = vadd.xlane.f32.xlu0 %v2164_v15  ;;  %738 = vadd.xlane.f32.xlu1 %v2176_v38  ;;  %v930_v15 = vld [vmem:[%s2870_s5] sm:$0xf] }
 0x111   :  { %v947_v61 = vrot.slane %v930_v15, %v1860_v4  ;;  %v958_v28 = vrot.slane %v930_v15, %v1857_v3  ;;  %v969_v59 = vrot.slane %v930_v15, %v1863_v5 }
 0x114   :  { %735 = vadd.xlane.f32.xlu0 %v2170_v58  ;;  %744 = vadd.xlane.f32.xlu1 %v2183_v33 }
 0x118   :  { %741 = vadd.xlane.f32.xlu0 %v2179_v40  ;;  %v936_v40 = vrot.slane %v930_v15, %v1854_v2 }
 0x11c   :  { %747 = vadd.xlane.f32.xlu0 %v2186_v42 }
 0x125   :  { %755 = vbcast.lane.b32.xlu1 %v753_v25, 256 }
 0x129   :  { %v2271_v20 = vpop.xlane.xlu1 %561  ;;  %v2273_v37 = vpop.xlane.xlu0 %558  ;;  %766 = vbcast.lane.b32.xlu1 %v764_v48, 256 }
 0x12d   :  { %v2275_v23 = vpop.xlane.xlu1 %582  ;;  %v2277_v55 = vpop.xlane.xlu0 %585  ;;  %770 = vbcast.lane.b32.xlu1 %v764_v48, 264 }
 0x131   :  { %v2280_v9 = vpop.xlane.xlu1 %606  ;;  %v2282_v13 = vpop.xlane.xlu0 %609  ;;  %781 = vbcast.lane.b32.xlu1 %v775_v8, 264 }
 0x132   :  { %759 = vbcast.lane.b32.xlu0 %v753_v25, 264 }
 0x135   :  { %v2288_v58 = vpop.xlane.xlu1 %630  ;;  %v2290_v38 = vpop.xlane.xlu0 %633  ;;  %792 = vbcast.lane.b32.xlu1 %v786_v39, 264 }
 0x136   :  { %777 = vbcast.lane.b32.xlu0 %v775_v8, 256 }
 0x139   :  { %v2293_v33 = vpop.xlane.xlu1 %654  ;;  %v2295_v42 = vpop.xlane.xlu0 %657  ;;  %942 = vbcast.lane.b32.xlu1 %v936_v40, 264 }
 0x13a   :  { %788 = vbcast.lane.b32.xlu0 %v786_v39, 256 }
 0x13d   :  { %v2298_v57 = vpop.xlane.xlu1 %678  ;;  %v2300_v49 = vpop.xlane.xlu0 %681  ;;  %953 = vbcast.lane.b32.xlu1 %v947_v61, 264 }
 0x13e   :  { %2877 = vst [vmem:[#allocation6_spill] sm:$0xff] %v2298_v57  ;;  %938 = vbcast.lane.b32.xlu0 %v936_v40, 256 }
 0x141   :  { %v2303_v2 = vpop.xlane.xlu1 %702  ;;  %v2305_v56 = vpop.xlane.xlu0 %705  ;;  %964 = vbcast.lane.b32.xlu1 %v958_v28, 264 }
 0x142   :  { %2878 = vst [vmem:[#allocation7_spill] sm:$0xff] %v2303_v2  ;;  %949 = vbcast.lane.b32.xlu0 %v947_v61, 256 }
 0x145   :  { %v2308_v4 = vpop.xlane.xlu1 %570  ;;  %v2310_v26 = vpop.xlane.xlu0 %564  ;;  %975 = vbcast.lane.b32.xlu1 %v969_v59, 264 }
 0x146   :  { %960 = vbcast.lane.b32.xlu0 %v958_v28, 256 }
 0x149   :  { %v2312_v45 = vpop.xlane.xlu1 %588  ;;  %v2314_v12 = vpop.xlane.xlu0 %567 }
 0x14a   :  { %971 = vbcast.lane.b32.xlu0 %v969_v59, 256 }
 0x14d   :  { %v2316_v3 = vpop.xlane.xlu1 %594  ;;  %v2318_v19 = vpop.xlane.xlu0 %573 }
 0x151   :  { %v2320_v62 = vpop.xlane.xlu1 %612  ;;  %v2322_v6 = vpop.xlane.xlu0 %591 }
 0x155   :  { %v2324_v5 = vpop.xlane.xlu1 %618  ;;  %v2326_v7 = vpop.xlane.xlu0 %597 }
 0x159   :  { %v2328_v41 = vpop.xlane.xlu1 %636  ;;  %v2330_v31 = vpop.xlane.xlu0 %615 }
 0x15d   :  { %v2332_v11 = vpop.xlane.xlu1 %642  ;;  %v2334_v51 = vpop.xlane.xlu0 %621 }
 0x161   :  { %v2336_v63 = vpop.xlane.xlu1 %660  ;;  %v2338_v50 = vpop.xlane.xlu0 %639 }
 0x165   :  { %v2340_v30 = vpop.xlane.xlu1 %666  ;;  %v2342_v18 = vpop.xlane.xlu0 %645 }
 0x166   :  { %2879 = vst [vmem:[#allocation8_spill] sm:$0xff] %v2340_v30 }
 0x169   :  { %v2344_v16 = vpop.xlane.xlu1 %684  ;;  %v2346_v32 = vpop.xlane.xlu0 %663 }
 0x16a   :  { %2880 = vst [vmem:[#allocation9_spill] sm:$0xff] %v2344_v16 }
 0x16d   :  { %v2348_v47 = vpop.xlane.xlu1 %690  ;;  %v2350_v27 = vpop.xlane.xlu0 %669 }
 0x16e   :  { %2881 = vst [vmem:[#allocation10_spill] sm:$0xff] %v2350_v27 }
 0x171   :  { %v2352_v29 = vpop.xlane.xlu1 %708  ;;  %v2354_v35 = vpop.xlane.xlu0 %687 }
 0x172   :  { %2882 = vst [vmem:[#allocation11_spill] sm:$0xff] %v2354_v35 }
 0x175   :  { %v2356_v36 = vpop.xlane.xlu1 %576  ;;  %v2358_v10 = vpop.xlane.xlu0 %693 }
 0x179   :  { %v2360_v34 = vpop.xlane.xlu1 %600  ;;  %v2362_v21 = vpop.xlane.xlu0 %579 }
 0x17a   :  { %2883 = vst [vmem:[#allocation12_spill] sm:$0xff] %v2360_v34 }
 0x17d   :  { %v2364_v60 = vpop.xlane.xlu1 %624  ;;  %v2366_v43 = vpop.xlane.xlu0 %603 }
 0x17e   :  { %2884 = vst [vmem:[#allocation13_spill] sm:$0xff] %v2364_v60 }
 0x181   :  { %v2368_v24 = vpop.xlane.xlu1 %648  ;;  %v2370_v44 = vpop.xlane.xlu0 %627 }
 0x182   :  { %2885 = vst [vmem:[#allocation14_spill] sm:$0xff] %v2368_v24  ;;  %2886 = vst [vmem:[#allocation15_spill] sm:$0xff] %v2370_v44 }
 0x185   :  { %v2372_v14 = vpop.xlane.xlu1 %672  ;;  %v2374_v52 = vpop.xlane.xlu0 %651 }
 0x186   :  { %2887 = vst [vmem:[#allocation16_spill] sm:$0xff] %v2372_v14  ;;  %2888 = vst [vmem:[#allocation17_spill] sm:$0xff] %v2374_v52 }
 0x189   :  { %v2376_v53 = vpop.xlane.xlu1 %696  ;;  %v2378_v54 = vpop.xlane.xlu0 %675 }
 0x18a   :  { %2889 = vst [vmem:[#allocation18_spill] sm:$0xff] %v2376_v53  ;;  %2890 = vst [vmem:[#allocation19_spill] sm:$0xff] %v2378_v54 }
 0x18d   :  { %v2380_v46 = vpop.xlane.xlu1 %714  ;;  %v2382_v22 = vpop.xlane.xlu0 %699 }
 0x18e   :  { %2891 = vst [vmem:[#allocation20_spill] sm:$0xff] %v2382_v22 }
 0x191   :  { %v2384_v25 = vpop.xlane.xlu1 %720  ;;  %v2386_v48 = vpop.xlane.xlu0 %711 }
 0x192   :  { %2892 = vst [vmem:[#allocation21_spill] sm:$0xff] %v2384_v25 }
 0x195   :  { %v2388_v8 = vpop.xlane.xlu1 %726  ;;  %v2390_v39 = vpop.xlane.xlu0 %717 }
 0x196   :  { %2893 = vst [vmem:[#allocation22_spill] sm:$0xff] %v2388_v8 }
 0x199   :  { %v733_v15 = vpop.xlane.xlu1 %732  ;;  %v2392_v40 = vpop.xlane.xlu0 %723 }
 0x19a   :  { %2894 = vst [vmem:[#allocation23_spill] sm:$0xff] %v2392_v40 }
 0x19d   :  { %v2394_v61 = vpop.xlane.xlu1 %738  ;;  %v2396_v17 = vpop.xlane.xlu0 %729 }
 0x1a1   :  { %v2398_v28 = vpop.xlane.xlu1 %744  ;;  %v2400_v59 = vpop.xlane.xlu0 %735 }
 0x1a2   :  { %2895 = vst [vmem:[#allocation24_spill] sm:$0xff] %v2398_v28 }
 0x1a5   :  { %v2402_v0 = vpop.permute.xlu1 %755  ;;  %v2404_v1 = vpop.xlane.xlu0 %741 }
 0x1a6   :  { %v802_v14 = vadd.f32 %v2402_v0, %v2273_v37  ;;  %v810_v30 = vadd.f32 %v2402_v0, %v2275_v23 }
 0x1a8   :  { %v866_v57 = vmax.f32 %v802_v14, 0.0  ;;  %v874_v60 = vmax.f32 %v810_v30, 0.0  ;;  %v818_v14 = vadd.f32 %v2402_v0, %v2280_v9  ;;  %v826_v30 = vadd.f32 %v2402_v0, %v2288_v58 }
 0x1a9   :  { %v2406_v25 = vpop.permute.xlu1 %766  ;;  %v2408_v8 = vpop.xlane.xlu0 %747 }
 0x1ad   :  { %v2410_v53 = vpop.permute.xlu1 %770  ;;  %v2412_v22 = vpop.permute.xlu0 %759 }
 0x1ae   :  { %v803_v28 = vadd.f32 %v2412_v22, %v2271_v20  ;;  %v811_v27 = vadd.f32 %v2412_v22, %v2277_v55  ;;  %v819_v23 = vadd.f32 %v2412_v22, %v2282_v13  ;;  %v843_v34 = vadd.f32 %v2412_v22, %v2300_v49 }
 0x1af   :  { %v827_v9 = vadd.f32 %v2412_v22, %v2290_v38  ;;  %v834_v49 = vadd.f32 %v2402_v0, %v2293_v33  ;;  %v890_v38 = vmax.f32 %v826_v30, 0.0  ;;  %v860_v33 = vadd.f32 %v2406_v25, %v733_v15 }
 0x1b0   :  { %v867_v35 = vmax.f32 %v803_v28, 0.0  ;;  %v875_v44 = vmax.f32 %v811_v27, 0.0 }
 0x1b1   :  { %v2414_v40 = vpop.permute.xlu1 %781  ;;  %v2416_v2 = vpop.permute.xlu0 %777 }
 0x1b2   :  { %v807_v15 = vadd.f32 %v2414_v40, %v2318_v19 }
 0x1b5   :  { %v2422_v54 = vpop.permute.xlu1 %792  ;;  %v2424_v16 = vpop.permute.xlu0 %788 }
 0x1b9   :  { %v2430_v24 = vpop.permute.xlu1 %942  ;;  %v2432_v52 = vpop.permute.xlu0 %938 }
 0x1ba   :  { %v986_v20 = vmul.f32 %v2430_v24, %v867_v35  ;;  %v985_v37 = vmul.f32 %v2432_v52, %v866_v57  ;;  %v993_v55 = vmul.f32 %v2432_v52, %v874_v60  ;;  %v994_v28 = vmul.f32 %v2430_v24, %v875_v44 }
 0x1bb   :  { %v882_v57 = vmax.f32 %v818_v14, 0.0  ;;  %v883_v35 = vmax.f32 %v819_v23, 0.0  ;;  %v907_v60 = vmax.f32 %v843_v34, 0.0  ;;  %v804_v44 = vadd.f32 %v2406_v25, %v2310_v26 }
 0x1bc   :  { %1117 = vperm.xlu1 %1768, %v986_v20   ;;  %1114 = vperm.xlu0 %1767, %v985_v37   ;;  %v852_v37 = vadd.f32 %v2406_v25, %v2352_v29  ;;  %v891_v14 = vmax.f32 %v827_v9, 0.0  ;;  %v835_v34 = vadd.f32 %v2412_v22, %v2295_v42  ;;  %v805_v42 = vadd.f32 %v2410_v53, %v2314_v12 }
 0x1bd   :  { %v1001_v27 = vmul.f32 %v2432_v52, %v882_v57  ;;  %v1002_v13 = vmul.f32 %v2430_v24, %v883_v35  ;;  %v2450_v20 = vpop.permute.xlu1 %953  ;;  %v2458_v58 = vpop.permute.xlu0 %949  ;;  %v2463_v23 = vmul.f32 %v2430_v24, %v907_v60  ;;  %v868_v29 = vmax.f32 %v804_v44, 0.0 }
 0x1be   :  { %v1010_v26 = vmul.f32 %v2430_v24, %v891_v14  ;;  %v2470_v57 = vadd.f32 %v2406_v25, %v2312_v45  ;;  %v916_v35 = vmax.f32 %v852_v37, 0.0  ;;  %v899_v30 = vmax.f32 %v835_v34, 0.0 }
 0x1bf   :  { %v847_v9 = vadd.f32 %v2414_v40, %v2358_v10  ;;  %v851_v45 = vadd.f32 %v2412_v22, %v2305_v56  ;;  %v853_v60 = vadd.f32 %v2410_v53, %v2386_v48  ;;  %v806_v10 = vadd.f32 %v2416_v2, %v2308_v4 }
 0x1c0   :  { %1138 = vperm.xlu1 %1768, %v993_v55   ;;  %1141 = vperm.xlu0 %1767, %v994_v28   ;;  %v1009_v55 = vmul.f32 %v2432_v52, %v890_v38  ;;  %v898_v28 = vmax.f32 %v834_v49, 0.0  ;;  %v924_v49 = vmax.f32 %v860_v33, 0.0  ;;  %v1018_v19 = vmul.f32 %v2430_v24, %v899_v30 }
 0x1c1   :  { %v2486_v44 = vpop.permute.xlu0 %960  ;;  %v911_v37 = vmax.f32 %v847_v9, 0.0  ;;  %v915_v14 = vmax.f32 %v851_v45, 0.0  ;;  %v2493_v34 = vmul.f32 %v2458_v58, %v916_v35  ;;  %v869_v56 = vmax.f32 %v805_v42, 0.0 }
 0x1c2   :  { %v1017_v12 = vmul.f32 %v2432_v52, %v898_v28  ;;  %v871_v48 = vmax.f32 %v807_v15, 0.0  ;;  %v813_v33 = vadd.f32 %v2410_v53, %v2322_v6  ;;  %v855_v35 = vadd.f32 %v2414_v40, %v2390_v39 }
 0x1c3   :  { %v2504_v4 = vmul.f32 %v2430_v24, %v915_v14  ;;  %v988_v30 = vmul.f32 %v2450_v20, %v869_v56  ;;  %v987_v42 = vmul.f32 %v2458_v58, %v868_v29  ;;  %v854_v6 = vadd.f32 %v2416_v2, %v2380_v46 }
 0x1c4   :  { %1162 = vperm.xlu1 %1768, %v1001_v27   ;;  %1165 = vperm.xlu0 %1767, %v1002_v13   ;;  %v2478_v27 = vpop.permute.xlu1 %964  ;;  %v846_v13 = vadd.f32 %v2416_v2, %v2348_v47  ;;  %v917_v47 = vmax.f32 %v853_v60, 0.0  ;;  %v859_v15 = vadd.f32 %v2412_v22, %v2396_v17  ;;  %v870_v9 = vmax.f32 %v806_v10, 0.0 }
 0x1c5   :  { %v861_v45 = vadd.f32 %v2410_v53, %v2400_v59  ;;  %v2520_v60 = vmul.f32 %v2458_v58, %v924_v49  ;;  %v918_v39 = vmax.f32 %v854_v6, 0.0  ;;  %v990_v29 = vmul.f32 %v2478_v27, %v871_v48 }
 0x1c6   :  { %v910_v38 = vmax.f32 %v846_v13, 0.0  ;;  %v2507_v28 = vmul.f32 %v2450_v20, %v917_v47  ;;  %v919_v13 = vmax.f32 %v855_v35, 0.0  ;;  %v863_v49 = vadd.f32 %v2414_v40, %v2404_v1 }
 0x1c7   :  { %v925_v22 = vmax.f32 %v861_v45, 0.0  ;;  %v2528_v17 = vmul.f32 %v2486_v44, %v918_v39  ;;  %v862_v10 = vadd.f32 %v2416_v2, %v2394_v61  ;;  %v2543_v47 = vadd.f32 %v2422_v54, %v2408_v8 }
 0x1c8   :  { %1186 = vperm.xlu1 %1768, %v1009_v55   ;;  %1189 = vperm.xlu0 %1767, %v1010_v26   ;;  %v2498_v55 = vmul.f32 %v2478_v27, %v911_v37  ;;  %v2501_v26 = vmul.f32 %v2486_v44, %v910_v38  ;;  %v2525_v46 = vmul.f32 %v2478_v27, %v919_v13  ;;  %v877_v37 = vmax.f32 %v813_v33, 0.0 }
 0x1c9   :  { %v876_v38 = vmax.f32 %v2470_v57, 0.0  ;;  %v2539_v14 = vmul.f32 %v2450_v20, %v925_v22  ;;  %v814_v1 = vadd.f32 %v2416_v2, %v2316_v3  ;;  %v927_v56 = vmax.f32 %v863_v49, 0.0 }
 0x1ca   :  { %v926_v61 = vmax.f32 %v862_v10, 0.0  ;;  %v996_v48 = vmul.f32 %v2450_v20, %v877_v37  ;;  %v820_v3 = vadd.f32 %v2406_v25, %v2320_v62  ;;  %v823_v13 = vadd.f32 %v2414_v40, %v2334_v51 }
 0x1cb   :  { %v995_v57 = vmul.f32 %v2458_v58, %v876_v38  ;;  %v2552_v33 = vmul.f32 %v2478_v27, %v927_v56  ;;  %v822_v45 = vadd.f32 %v2416_v2, %v2324_v5  ;;  %v831_v10 = vadd.f32 %v2414_v40, %v2342_v18 }
 0x1cc   :  { %1210 = vperm.xlu1 %1768, %v1017_v12   ;;  %1213 = vperm.xlu0 %1767, %v1018_v19   ;;  %v923_v12 = vmax.f32 %v859_v15, 0.0  ;;  %v989_v19 = vmul.f32 %v2486_v44, %v870_v9  ;;  %v2555_v8 = vmul.f32 %v2486_v44, %v926_v61  ;;  %v884_v9 = vmax.f32 %v820_v3, 0.0 }
 0x1cd   :  { %v887_v62 = vmax.f32 %v823_v13, 0.0  ;;  %v830_v37 = vadd.f32 %v2416_v2, %v2332_v11  ;;  %v836_v56 = vadd.f32 %v2406_v25, %v2336_v63  ;;  %v2595_v63 = vpop.permute.xlu0 %971 }
 0x1ce   :  { %v2531_v59 = vmul.f32 %v2430_v24, %v923_v12  ;;  %v815_v24 = vadd.f32 %v2414_v40, %v2326_v7  ;;  %v821_v7 = vadd.f32 %v2410_v53, %v2330_v31  ;;  %v1003_v31 = vmul.f32 %v2458_v58, %v884_v9 }
 0x1cf   :  { %v886_v12 = vmax.f32 %v822_v45, 0.0  ;;  %v1006_v22 = vmul.f32 %v2478_v27, %v887_v62  ;;  %v2898_v62 = vld [vmem:[#allocation13_spill] sm:$0xff] }
 0x1d0   :  { %1123 = vperm.xlu0 %1767, %v988_v30   ;;  %1120 = vperm.xlu1 %1768, %v987_v42   ;;  %v879_v35 = vmax.f32 %v815_v24, 0.0  ;;  %v878_v30 = vmax.f32 %v814_v1, 0.0  ;;  %v885_v15 = vmax.f32 %v821_v7, 0.0  ;;  %v894_v24 = vmax.f32 %v830_v37, 0.0  ;;  %v2593_v7 = vpop.permute.xlu1 %975 }
 0x1d1   :  { %v1005_v51 = vmul.f32 %v2486_v44, %v886_v12  ;;  %v837_v1 = vadd.f32 %v2410_v53, %v2346_v32  ;;  %v824_v12 = vadd.f32 %v2424_v16, %v2898_v62 }
 0x1d2   :  { %v998_v42 = vmul.f32 %v2478_v27, %v879_v35  ;;  %v997_v6 = vmul.f32 %v2486_v44, %v878_v30  ;;  %v1004_v39 = vmul.f32 %v2450_v20, %v885_v15  ;;  %v1013_v18 = vmul.f32 %v2486_v44, %v894_v24  ;;  %v2896_v15 = vld [vmem:[#allocation12_spill] sm:$0xff]  ;;  %v2901_v24 = vld [vmem:[#allocation10_spill] sm:$0xff] }
 0x1d3   :  { %v901_v11 = vmax.f32 %v837_v1, 0.0  ;;  %v808_v35 = vadd.f32 %v2424_v16, %v2356_v36  ;;  %v839_v1 = vadd.f32 %v2414_v40, %v2901_v24 }
 0x1d4   :  { %1129 = vperm.xlu0 %1767, %v990_v29   ;;  %1126 = vperm.xlu1 %1768, %v989_v19   ;;  %v829_v29 = vadd.f32 %v2410_v53, %v2338_v50  ;;  %v828_v19 = vadd.f32 %v2406_v25, %v2328_v41  ;;  %v895_v41 = vmax.f32 %v831_v10, 0.0 }
 0x1d5   :  { %v1020_v30 = vmul.f32 %v2450_v20, %v901_v11 }
 0x1d6   :  { %v893_v5 = vmax.f32 %v829_v29, 0.0  ;;  %v892_v49 = vmax.f32 %v828_v19, 0.0  ;;  %v1014_v61 = vmul.f32 %v2478_v27, %v895_v41 }
 0x1d8   :  { %1147 = vperm.xlu0 %1767, %v996_v48   ;;  %1144 = vperm.xlu1 %1768, %v995_v57   ;;  %v1012_v38 = vmul.f32 %v2450_v20, %v893_v5  ;;  %v1011_v50 = vmul.f32 %v2458_v58, %v892_v49  ;;  %v900_v48 = vmax.f32 %v836_v56, 0.0  ;;  %v809_v57 = vadd.f32 %v2422_v54, %v2362_v21  ;;  %v2900_v49 = vld [vmem:[#allocation14_spill] sm:$0xff]  ;;  %v2902_v56 = vld [vmem:[#allocation8_spill] sm:$0xff] }
 0x1d9   :  { %v816_v21 = vadd.f32 %v2424_v16, %v2896_v15  ;;  %v832_v10 = vadd.f32 %v2424_v16, %v2900_v49 }
 0x1da   :  { %v1019_v32 = vmul.f32 %v2458_v58, %v900_v48  ;;  %v873_v3 = vmax.f32 %v809_v57, 0.0  ;;  %v903_v48 = vmax.f32 %v839_v1, 0.0 }
 0x1db   :  { %v880_v45 = vmax.f32 %v816_v21, 0.0  ;;  %v896_v41 = vmax.f32 %v832_v10, 0.0 }
 0x1dc   :  { %1153 = vperm.xlu0 %1767, %v998_v42   ;;  %1150 = vperm.xlu1 %1768, %v997_v6   ;;  %v872_v42 = vmax.f32 %v808_v35, 0.0  ;;  %v817_v6 = vadd.f32 %v2422_v54, %v2366_v43  ;;  %v992_v36 = vmul.f32 %v2593_v7, %v873_v3  ;;  %v2903_v35 = vld [vmem:[#allocation6_spill] sm:$0xff] }
 0x1dd   :  { %v999_v43 = vmul.f32 %v2595_v63, %v880_v45  ;;  %v1015_v11 = vmul.f32 %v2595_v63, %v896_v41 }
 0x1de   :  { %v991_v9 = vmul.f32 %v2595_v63, %v872_v42  ;;  %v881_v13 = vmax.f32 %v817_v6, 0.0  ;;  %v2904_v42 = vld [vmem:[#allocation11_spill] sm:$0xff]  ;;  %v2905_v6 = vld [vmem:[#allocation9_spill] sm:$0xff] }
 0x1df   :  { %v844_v15 = vadd.f32 %v2406_v25, %v2905_v6 }
 0x1e0   :  { %1171 = vperm.xlu0 %1767, %v1004_v39   ;;  %1168 = vperm.xlu1 %1768, %v1003_v31   ;;  %v2897_v39 = vld [vmem:[#allocation15_spill] sm:$0xff]  ;;  %v1000_v29 = vmul.f32 %v2593_v7, %v881_v13 }
 0x1e1   :  { %v825_v31 = vadd.f32 %v2422_v54, %v2897_v39  ;;  %v2906_v13 = vld [vmem:[#allocation19_spill] sm:$0xff] }
 0x1e3   :  { %v889_v19 = vmax.f32 %v825_v31, 0.0 }
 0x1e4   :  { %1177 = vperm.xlu0 %1767, %v1006_v22   ;;  %1174 = vperm.xlu1 %1768, %v1005_v51   ;;  %v888_v22 = vmax.f32 %v824_v12, 0.0  ;;  %v2899_v51 = vld [vmem:[#allocation17_spill] sm:$0xff]  ;;  %v2908_v12 = vld [vmem:[#allocation7_spill] sm:$0xff] }
 0x1e5   :  { %v833_v5 = vadd.f32 %v2422_v54, %v2899_v51  ;;  %v1008_v37 = vmul.f32 %v2593_v7, %v889_v19 }
 0x1e8   :  { %1195 = vperm.xlu0 %1767, %v1012_v38   ;;  %1192 = vperm.xlu1 %1768, %v1011_v50   ;;  %v1007_v38 = vmul.f32 %v2595_v63, %v888_v22  ;;  %v897_v50 = vmax.f32 %v833_v5, 0.0  ;;  %v2910_v22 = vld [vmem:[#allocation18_spill] sm:$0xff] }
 0x1e9   :  { %v848_v51 = vadd.f32 %v2424_v16, %v2910_v22 }
 0x1ec   :  { %1201 = vperm.xlu0 %1767, %v1014_v61   ;;  %1198 = vperm.xlu1 %1768, %v1013_v18   ;;  %v838_v61 = vadd.f32 %v2416_v2, %v2902_v56  ;;  %v1016_v18 = vmul.f32 %v2593_v7, %v897_v50  ;;  %v845_v2 = vadd.f32 %v2410_v53, %v2904_v42  ;;  %v2913_v50 = vld [vmem:[#allocation21_spill] sm:$0xff] }
 0x1ed   :  { %v856_v41 = vadd.f32 %v2424_v16, %v2913_v50 }
 0x1ee   :  { %v902_v57 = vmax.f32 %v838_v61, 0.0 }
 0x1f0   :  { %1219 = vperm.xlu0 %1767, %v1020_v30   ;;  %1216 = vperm.xlu1 %1768, %v1019_v32   ;;  %v842_v30 = vadd.f32 %v2402_v0, %v2903_v35  ;;  %v1022_v32 = vmul.f32 %v2478_v27, %v903_v48  ;;  %v1021_v3 = vmul.f32 %v2486_v44, %v902_v57  ;;  %v2907_v44 = vld [vmem:[#allocation16_spill] sm:$0xff] }
 0x1f1   :  { %v841_v27 = vadd.f32 %v2422_v54, %v2906_v13  ;;  %v840_v45 = vadd.f32 %v2424_v16, %v2907_v44 }
 0x1f2   :  { %v906_v40 = vmax.f32 %v842_v30, 0.0 }
 0x1f3   :  { %v905_v25 = vmax.f32 %v841_v27, 0.0  ;;  %v904_v31 = vmax.f32 %v840_v45, 0.0 }
 0x1f4   :  { %1135 = vperm.xlu0 %1767, %v992_v36   ;;  %1132 = vperm.xlu1 %1768, %v991_v9   ;;  %v1025_v21 = vmul.f32 %v2432_v52, %v906_v40  ;;  %v909_v36 = vmax.f32 %v845_v2, 0.0  ;;  %v908_v9 = vmax.f32 %v844_v15, 0.0 }
 0x1f5   :  { %v1024_v62 = vmul.f32 %v2593_v7, %v905_v25 }
 0x1f6   :  { %v1028_v39 = vmul.f32 %v2450_v20, %v909_v36  ;;  %v1027_v53 = vmul.f32 %v2458_v58, %v908_v9 }
 0x1f8   :  { %1159 = vperm.xlu0 %1767, %v1000_v29   ;;  %1156 = vperm.xlu1 %1768, %v999_v43   ;;  %v850_v29 = vadd.f32 %v2402_v0, %v2908_v12  ;;  %v2909_v43 = vld [vmem:[#allocation20_spill] sm:$0xff] }
 0x1f9   :  { %v849_v19 = vadd.f32 %v2422_v54, %v2909_v43 }
 0x1fa   :  { %v914_v20 = vmax.f32 %v850_v29, 0.0 }
 0x1fb   :  { %v913_v5 = vmax.f32 %v849_v19, 0.0 }
 0x1fc   :  { %1183 = vperm.xlu0 %1767, %v1008_v37   ;;  %1180 = vperm.xlu1 %1768, %v1007_v38   ;;  %v1033_v58 = vmul.f32 %v2432_v52, %v914_v20 }
 0x200   :  { %1207 = vperm.xlu0 %1767, %v1016_v18   ;;  %1204 = vperm.xlu1 %1768, %v1015_v11  }
 0x204   :  { %1225 = vperm.xlu0 %1767, %v1022_v32   ;;  %1222 = vperm.xlu1 %1768, %v1021_v3  }
 0x208   :  { %1237 = vperm.xlu0 %1767, %v2463_v23   ;;  %1234 = vperm.xlu1 %1768, %v1025_v21   ;;  %v1023_v23 = vmul.f32 %v2595_v63, %v904_v31 }
 0x20c   :  { %1243 = vperm.xlu0 %1767, %v1028_v39   ;;  %1240 = vperm.xlu1 %1768, %v1027_v53  }
 0x210   :  { %1231 = vperm.xlu0 %1767, %v1024_v62   ;;  %1228 = vperm.xlu1 %1768, %v1023_v23  }
 0x214   :  { %1249 = vperm.xlu0 %1767, %v2498_v55   ;;  %1246 = vperm.xlu1 %1768, %v2501_v26   ;;  %v912_v55 = vmax.f32 %v848_v51, 0.0  ;;  %v1032_v26 = vmul.f32 %v2593_v7, %v913_v5 }
 0x216   :  { %v1031_v49 = vmul.f32 %v2595_v63, %v912_v55 }
 0x218   :  { %1261 = vperm.xlu0 %1767, %v2504_v4   ;;  %1258 = vperm.xlu1 %1768, %v1033_v58   ;;  %v2911_v4 = vld [vmem:[#allocation22_spill] sm:$0xff] }
 0x219   :  { %v858_v10 = vadd.f32 %v2402_v0, %v2911_v4 }
 0x21b   :  { %v922_v37 = vmax.f32 %v858_v10, 0.0 }
 0x21c   :  { %1267 = vperm.xlu0 %1767, %v2507_v28   ;;  %1264 = vperm.xlu1 %1768, %v2493_v34   ;;  %v2912_v34 = vld [vmem:[#allocation23_spill] sm:$0xff] }
 0x21d   :  { %v1041_v28 = vmul.f32 %v2432_v52, %v922_v37  ;;  %v857_v38 = vadd.f32 %v2422_v54, %v2912_v34  ;;  %v2914_v52 = vld [vmem:[#allocation24_spill] sm:$0xff]  ;;  %v929_v54 = vmax.f32 %v2543_v47, 0.0 }
 0x21f   :  { %v921_v0 = vmax.f32 %v857_v38, 0.0 }
 0x220   :  { %1255 = vperm.xlu0 %1767, %v1032_v26   ;;  %1252 = vperm.xlu1 %1768, %v1031_v49  }
 0x224   :  { %1273 = vperm.xlu0 %1767, %v2525_v46   ;;  %1270 = vperm.xlu1 %1768, %v2528_v17   ;;  %v920_v46 = vmax.f32 %v856_v41, 0.0  ;;  %v1040_v17 = vmul.f32 %v2593_v7, %v921_v0 }
 0x226   :  { %v1039_v24 = vmul.f32 %v2595_v63, %v920_v46 }
 0x228   :  { %1285 = vperm.xlu0 %1767, %v2531_v59   ;;  %1282 = vperm.xlu1 %1768, %v1041_v28   ;;  %v864_v59 = vadd.f32 %v2424_v16, %v2914_v52  ;;  %v2915_v16 = vlaneseq }
 0x22a   :  { %v1306_v48 = vand.u32 127, %v2915_v16 }
 0x22c   :  { %1291 = vperm.xlu0 %1767, %v2539_v14   ;;  %1288 = vperm.xlu1 %1768, %v2520_v60   ;;  %v928_v14 = vmax.f32 %v864_v59, 0.0  ;;  %v1048_v60 = vmul.f32 %v2593_v7, %v929_v54  ;;  %v1311_v47 = vadd.s32 4294967288, %v1306_v48 }
 0x22e   :  { %v1047_v1 = vmul.f32 %v2595_v63, %v928_v14  ;;  %v2916_v63 = vld [vmem:[#allocation5_spill] sm:$0xff] }
 0x22f   :  { %v2688_v35 = vsub.s32 %v1311_v47, %v2916_v63  ;;  %v2691_v30 = vsub.s32 %v1306_v48, %v2916_v63 }
 0x230   :  { %1279 = vperm.xlu0 %1767, %v1040_v17   ;;  %1276 = vperm.xlu1 %1768, %v1039_v24  }
 0x234   :  { %1297 = vperm.xlu0 %1767, %v2552_v33   ;;  %1294 = vperm.xlu1 %1768, %v2555_v8  }
 0x238   :  { %1303 = vperm.xlu0 %1767, %v1048_v60   ;;  %1300 = vperm.xlu1 %1768, %v1047_v1  }
 0x23b   :  { %v1118_v56 = vpop.permute.xlu1 %1117  ;;  %v1115_v61 = vpop.permute.xlu0 %1114 }
 0x23c   :  { %v1315_v19 = vrot.slane %v1118_v56, %v2688_v35  ;;  %v1310_v22 = vrot.slane %v1115_v61, %v2691_v30 }
 0x23e   :  { %v1317_v28 = vsel %vm1316_vm1, %v1315_v19, %v1310_v22 }
 0x23f   :  { %v2674_v18 = vpop.permute.xlu1 %1138  ;;  %v2676_v11 = vpop.permute.xlu0 %1141 }
 0x240   :  { %v1348_v34 = vrot.slane %v2674_v18, %v2691_v30  ;;  %v1352_v38 = vrot.slane %v2676_v11, %v2688_v35 }
 0x242   :  { %v1353_v61 = vsel %vm1316_vm1, %v1352_v38, %v1348_v34 }
 0x243   :  { %v2679_v33 = vpop.permute.xlu1 %1162  ;;  %v2681_v8 = vpop.permute.xlu0 %1165 }
 0x244   :  { %v1384_v24 = vrot.slane %v2679_v33, %v2691_v30  ;;  %v1388_v52 = vrot.slane %v2681_v8, %v2688_v35 }
 0x247   :  { %v2683_v57 = vpop.permute.xlu1 %1186  ;;  %v2685_v7 = vpop.permute.xlu0 %1189 }
 0x24b   :  { %v1211_v32 = vpop.permute.xlu1 %1210  ;;  %v1214_v3 = vpop.permute.xlu0 %1213 }
 0x24c   :  { %v1456_v40 = vrot.slane %v1211_v32, %v2691_v30  ;;  %v1460_v42 = vrot.slane %v1214_v3, %v2688_v35  ;;  %v1389_v3 = vsel %vm1316_vm1, %v1388_v52, %v1384_v24 }
 0x24e   :  { %v2696_v2 = vsel %vm1316_vm1, %v1460_v42, %v1456_v40  ;;  %v1420_v40 = vrot.slane %v2683_v57, %v2691_v30 }
 0x24f   :  { %v1121_v6 = vpop.permute.xlu1 %1120  ;;  %v1124_v15 = vpop.permute.xlu0 %1123 }
 0x250   :  { %v1321_v29 = vrot.slane %v1121_v6, %v2691_v30  ;;  %v1325_v20 = vrot.slane %v1124_v15, %v2688_v35 }
 0x252   :  { %v1326_v55 = vsel %vm1316_vm1, %v1325_v20, %v1321_v29 }
 0x253   :  { %v1127_v21 = vpop.permute.xlu1 %1126  ;;  %v1130_v36 = vpop.permute.xlu0 %1129  ;;  %v1598_v17 = vsel %vm1597_vm2, %v1326_v55, %v1317_v28 }
 0x254   :  { %v1330_v58 = vrot.slane %v1127_v21, %v2691_v30  ;;  %v1334_v43 = vrot.slane %v1130_v36, %v2688_v35 }
 0x256   :  { %v1335_v4 = vsel %vm1316_vm1, %v1334_v43, %v1330_v58 }
 0x257   :  { %v1145_v9 = vpop.permute.xlu1 %1144  ;;  %v1148_v13 = vpop.permute.xlu0 %1147  ;;  %v1600_v54 = vsel %vm1599_vm3, %v1335_v4, %v1598_v17 }
 0x258   :  { %v1357_v26 = vrot.slane %v1145_v9, %v2691_v30  ;;  %v1361_v49 = vrot.slane %v1148_v13, %v2688_v35 }
 0x25a   :  { %v1362_v59 = vsel %vm1316_vm1, %v1361_v49, %v1357_v26 }
 0x25b   :  { %v1151_v27 = vpop.permute.xlu1 %1150  ;;  %v1154_v44 = vpop.permute.xlu0 %1153  ;;  %v1603_v32 = vsel %vm1597_vm2, %v1362_v59, %v1353_v61 }
 0x25c   :  { %v1366_v10 = vrot.slane %v1151_v27, %v2691_v30  ;;  %v1370_v37 = vrot.slane %v1154_v44, %v2688_v35 }
 0x25e   :  { %v1371_v14 = vsel %vm1316_vm1, %v1370_v37, %v1366_v10 }
 0x25f   :  { %v1169_v45 = vpop.permute.xlu1 %1168  ;;  %v1172_v39 = vpop.permute.xlu0 %1171  ;;  %v1604_v42 = vsel %vm1599_vm3, %v1371_v14, %v1603_v32 }
 0x260   :  { %v1393_v60 = vrot.slane %v1169_v45, %v2691_v30  ;;  %v1397_v1 = vrot.slane %v1172_v39, %v2688_v35  ;;  %v1424_v39 = vrot.slane %v2685_v7, %v2688_v35 }
 0x262   :  { %v1398_v6 = vsel %vm1316_vm1, %v1397_v1, %v1393_v60  ;;  %v1425_v19 = vsel %vm1316_vm1, %v1424_v39, %v1420_v40 }
 0x263   :  { %v1175_v53 = vpop.permute.xlu1 %1174  ;;  %v1178_v25 = vpop.permute.xlu0 %1177 }
 0x264   :  { %v1402_v18 = vrot.slane %v1175_v53, %v2691_v30  ;;  %v1406_v11 = vrot.slane %v1178_v25, %v2688_v35 }
 0x266   :  { %v1407_v9 = vsel %vm1316_vm1, %v1406_v11, %v1402_v18 }
 0x267   :  { %v2698_v31 = vpop.permute.xlu1 %1192  ;;  %v2700_v62 = vpop.permute.xlu0 %1195 }
 0x268   :  { %v1429_v15 = vrot.slane %v2698_v31, %v2691_v30  ;;  %v1433_v21 = vrot.slane %v2700_v62, %v2688_v35  ;;  %v1606_v62 = vsel %vm1597_vm2, %v1398_v6, %v1389_v3 }
 0x269   :  { %v1607_v29 = vsel %vm1599_vm3, %v1407_v9, %v1606_v62 }
 0x26b   :  { %v2702_v23 = vpop.permute.xlu1 %1198  ;;  %v2704_v12 = vpop.permute.xlu0 %1201 }
 0x26c   :  { %v1438_v13 = vrot.slane %v2702_v23, %v2691_v30  ;;  %v1442_v57 = vrot.slane %v2704_v12, %v2688_v35  ;;  %v1434_v23 = vsel %vm1316_vm1, %v1433_v21, %v1429_v15 }
 0x26d   :  { %v1609_v49 = vsel %vm1597_vm2, %v1434_v23, %v1425_v19 }
 0x26e   :  { %v1443_v20 = vsel %vm1316_vm1, %v1442_v57, %v1438_v13 }
 0x26f   :  { %v2712_v51 = vpop.permute.xlu1 %1216  ;;  %v2714_v5 = vpop.permute.xlu0 %1219  ;;  %v1610_v10 = vsel %vm1599_vm3, %v1443_v20, %v1609_v49 }
 0x273   :  { %v1133_v50 = vpop.permute.xlu1 %1132  ;;  %v1136_v41 = vpop.permute.xlu0 %1135 }
 0x274   :  { %v1339_v0 = vrot.slane %v1133_v50, %v2691_v30  ;;  %v1343_v46 = vrot.slane %v1136_v41, %v2688_v35 }
 0x276   :  { %v1344_v56 = vsel %vm1316_vm1, %v1343_v46, %v1339_v0  ;;  %v1465_v0 = vrot.slane %v2712_v51, %v2691_v30  ;;  %v1469_v46 = vrot.slane %v2714_v5, %v2688_v35 }
 0x277   :  { %v1157_v16 = vpop.permute.xlu1 %1156  ;;  %v1160_v48 = vpop.permute.xlu0 %1159  ;;  %v1602_v33 = vsel %vm1601_vm4, %v1344_v56, %v1600_v54 }
 0x278   :  { %v1375_v8 = vrot.slane %v1157_v16, %v2691_v30  ;;  %v1379_v47 = vrot.slane %v1160_v48, %v2688_v35  ;;  %v1633_v63 = vsel %vm1632_vm5, %v1602_v33, 0.0  ;;  %v1470_v54 = vsel %vm1316_vm1, %v1469_v46, %v1465_v0 }
 0x279   :  { %1634 = vadd.xlane.f32.xlu1 %v1633_v63  ;;  %v1612_v51 = vsel %vm1597_vm2, %v1470_v54, %v2696_v2 }
 0x27a   :  { %v1380_v36 = vsel %vm1316_vm1, %v1379_v47, %v1375_v8 }
 0x27b   :  { %v1181_v27 = vpop.permute.xlu1 %1180  ;;  %v1184_v44 = vpop.permute.xlu0 %1183  ;;  %v1605_v45 = vsel %vm1601_vm4, %v1380_v36, %v1604_v42 }
 0x27c   :  { %v1411_v53 = vrot.slane %v1181_v27, %v2691_v30  ;;  %v1415_v25 = vrot.slane %v1184_v44, %v2688_v35  ;;  %v1636_v31 = vsel %vm1632_vm5, %v1605_v45, 0.0 }
 0x27d   :  { %1637 = vadd.xlane.f32.xlu0 %v1636_v31 }
 0x27e   :  { %v1416_v12 = vsel %vm1316_vm1, %v1415_v25, %v1411_v53 }
 0x27f   :  { %v1205_v58 = vpop.permute.xlu1 %1204  ;;  %v1208_v43 = vpop.permute.xlu0 %1207  ;;  %v1608_v7 = vsel %vm1601_vm4, %v1416_v12, %v1607_v29 }
 0x280   :  { %v1447_v22 = vrot.slane %v1205_v58, %v2691_v30  ;;  %v1451_v55 = vrot.slane %v1208_v43, %v2688_v35  ;;  %v1639_v26 = vsel %vm1632_vm5, %v1608_v7, 0.0 }
 0x281   :  { %1640 = vadd.xlane.f32.xlu0 %v1639_v26 }
 0x282   :  { %v1452_v4 = vsel %vm1316_vm1, %v1451_v55, %v1447_v22 }
 0x283   :  { %v1223_v37 = vpop.permute.xlu1 %1222  ;;  %v1226_v28 = vpop.permute.xlu0 %1225  ;;  %v1611_v34 = vsel %vm1601_vm4, %v1452_v4, %v1610_v10 }
 0x284   :  { %v1642_v38 = vsel %vm1632_vm5, %v1611_v34, 0.0  ;;  %v1474_v17 = vrot.slane %v1223_v37, %v2691_v30  ;;  %v1478_v24 = vrot.slane %v1226_v28, %v2688_v35 }
 0x285   :  { %1643 = vadd.xlane.f32.xlu1 %v1642_v38 }
 0x286   :  { %v1479_v14 = vsel %vm1316_vm1, %v1478_v24, %v1474_v17 }
 0x287   :  { %v1235_v50 = vpop.permute.xlu1 %1234  ;;  %v1238_v41 = vpop.permute.xlu0 %1237  ;;  %v1613_v18 = vsel %vm1599_vm3, %v1479_v14, %v1612_v51 }
 0x288   :  { %v1492_v6 = vrot.slane %v1235_v50, %v2691_v30  ;;  %v1496_v15 = vrot.slane %v1238_v41, %v2688_v35 }
 0x28a   :  { %v1497_v57 = vsel %vm1316_vm1, %v1496_v15, %v1492_v6 }
 0x28b   :  { %v1241_v52 = vpop.permute.xlu1 %1240  ;;  %v1244_v59 = vpop.permute.xlu0 %1243 }
 0x28c   :  { %v1501_v63 = vrot.slane %v1241_v52, %v2691_v30  ;;  %v1505_v32 = vrot.slane %v1244_v59, %v2688_v35 }
 0x28e   :  { %v1506_v21 = vsel %vm1316_vm1, %v1505_v32, %v1501_v63 }
 0x28f   :  { %v1229_v60 = vpop.permute.xlu1 %1228  ;;  %v1232_v1 = vpop.permute.xlu0 %1231  ;;  %v1615_v45 = vsel %vm1597_vm2, %v1506_v21, %v1497_v57 }
 0x290   :  { %v1483_v56 = vrot.slane %v1229_v60, %v2691_v30  ;;  %v1487_v61 = vrot.slane %v1232_v1, %v2688_v35 }
 0x292   :  { %v1488_v5 = vsel %vm1316_vm1, %v1487_v61, %v1483_v56 }
 0x293   :  { %v1247_v11 = vpop.permute.xlu1 %1246  ;;  %v1250_v16 = vpop.permute.xlu0 %1249  ;;  %v1614_v48 = vsel %vm1601_vm4, %v1488_v5, %v1613_v18 }
 0x294   :  { %v1645_v33 = vsel %vm1632_vm5, %v1614_v48, 0.0  ;;  %v1510_v3 = vrot.slane %v1247_v11, %v2691_v30  ;;  %v1514_v2 = vrot.slane %v1250_v16, %v2688_v35 }
 0x295   :  { %1646 = vadd.xlane.f32.xlu0 %v1645_v33 }
 0x296   :  { %v1515_v36 = vsel %vm1316_vm1, %v1514_v2, %v1510_v3  ;;  %v1761_v3 = vld [vmem:[%s2871_s6] ss:$0 sm:$0xff] }
 0x297   :  { %v1259_v8 = vpop.permute.xlu1 %1258  ;;  %v1262_v47 = vpop.permute.xlu0 %1261  ;;  %v1616_v53 = vsel %vm1599_vm3, %v1515_v36, %v1615_v45 }
 0x298   :  { %v1528_v55 = vrot.slane %v1259_v8, %v2691_v30  ;;  %v1532_v26 = vrot.slane %v1262_v47, %v2688_v35 }
 0x29a   :  { %v1533_v28 = vsel %vm1316_vm1, %v1532_v26, %v1528_v55 }
 0x29b   :  { %v1265_v40 = vpop.permute.xlu1 %1264  ;;  %v1268_v42 = vpop.permute.xlu0 %1267 }
 0x29c   :  { %v1537_v20 = vrot.slane %v1265_v40, %v2691_v30  ;;  %v1541_v58 = vrot.slane %v1268_v42, %v2688_v35 }
 0x29e   :  { %v1542_v49 = vsel %vm1316_vm1, %v1541_v58, %v1537_v20 }
 0x29f   :  { %v1253_v9 = vpop.permute.xlu1 %1252  ;;  %v1256_v13 = vpop.permute.xlu0 %1255  ;;  %v1618_v50 = vsel %vm1597_vm2, %v1542_v49, %v1533_v28 }
 0x2a0   :  { %v1519_v27 = vrot.slane %v1253_v9, %v2691_v30  ;;  %v1523_v44 = vrot.slane %v1256_v13, %v2688_v35 }
 0x2a2   :  { %v1524_v39 = vsel %vm1316_vm1, %v1523_v44, %v1519_v27 }
 0x2a3   :  { %v1271_v25 = vpop.permute.xlu1 %1270  ;;  %v1274_v31 = vpop.permute.xlu0 %1273  ;;  %v1617_v62 = vsel %vm1601_vm4, %v1524_v39, %v1616_v53 }
 0x2a4   :  { %v1648_v23 = vsel %vm1632_vm5, %v1617_v62, 0.0  ;;  %v1546_v43 = vrot.slane %v1271_v25, %v2691_v30  ;;  %v1550_v7 = vrot.slane %v1274_v31, %v2688_v35 }
 0x2a5   :  { %1649 = vadd.xlane.f32.xlu1 %v1648_v23 }
 0x2a6   :  { %v1551_v4 = vsel %vm1316_vm1, %v1550_v7, %v1546_v43 }
 0x2a7   :  { %v1283_v12 = vpop.permute.xlu1 %1282  ;;  %v1286_v29 = vpop.permute.xlu0 %1285  ;;  %v1619_v17 = vsel %vm1599_vm3, %v1551_v4, %v1618_v50 }
 0x2a8   :  { %v1564_v24 = vrot.slane %v1283_v12, %v2691_v30  ;;  %v1568_v14 = vrot.slane %v1286_v29, %v2688_v35 }
 0x2aa   :  { %v1569_v11 = vsel %vm1316_vm1, %v1568_v14, %v1564_v24 }
 0x2ab   :  { %v1289_v19 = vpop.permute.xlu1 %1288  ;;  %v1292_v22 = vpop.permute.xlu0 %1291 }
 0x2ac   :  { %v1573_v41 = vrot.slane %v1289_v19, %v2691_v30  ;;  %v1577_v0 = vrot.slane %v1292_v22, %v2688_v35 }
 0x2ae   :  { %v1578_v61 = vsel %vm1316_vm1, %v1577_v0, %v1573_v41 }
 0x2af   :  { %v1277_v10 = vpop.permute.xlu1 %1276  ;;  %v1280_v37 = vpop.permute.xlu0 %1279  ;;  %v1621_v33 = vsel %vm1597_vm2, %v1578_v61, %v1569_v11 }
 0x2b0   :  { %v1555_v34 = vrot.slane %v1277_v10, %v2691_v30  ;;  %v1559_v38 = vrot.slane %v1280_v37, %v2688_v35 }
 0x2b2   :  { %v1560_v46 = vsel %vm1316_vm1, %v1559_v38, %v1555_v34 }
 0x2b3   :  { %v1295_v52 = vpop.permute.xlu1 %1294  ;;  %v1298_v59 = vpop.permute.xlu0 %1297  ;;  %v1620_v54 = vsel %vm1601_vm4, %v1560_v46, %v1619_v17 }
 0x2b4   :  { %v1582_v60 = vrot.slane %v1295_v52, %v2691_v30  ;;  %v1586_v1 = vrot.slane %v1298_v59, %v2688_v35  ;;  %v1651_v56 = vsel %vm1632_vm5, %v1620_v54, 0.0 }
 0x2b5   :  { %1652 = vadd.xlane.f32.xlu0 %v1651_v56 }
 0x2b6   :  { %v1587_v51 = vsel %vm1316_vm1, %v1586_v1, %v1582_v60 }
 0x2b7   :  { %v1301_v5 = vpop.permute.xlu1 %1300  ;;  %v1304_v18 = vpop.permute.xlu0 %1303  ;;  %v1622_v47 = vsel %vm1599_vm3, %v1587_v51, %v1621_v33 }
 0x2b8   :  { %v1591_v16 = vrot.slane %v1301_v5, %v2691_v30  ;;  %v1595_v48 = vrot.slane %v1304_v18, %v2688_v35 }
 0x2ba   :  { %v1596_v8 = vsel %vm1316_vm1, %v1595_v48, %v1591_v16 }
 0x2bb   :  { %v1623_v63 = vsel %vm1601_vm4, %v1596_v8, %v1622_v47 }
 0x2bc   :  { %v1654_v32 = vsel %vm1632_vm5, %v1623_v63, 0.0 }
 0x2bd   :  { %1655 = vadd.xlane.f32.xlu1 %v1654_v32 }
 0x2cb   :  { %1663 = vbcast.lane.b32.xlu0 %v1761_v3, 256 }
 0x306   :  { %v1635_v6 = vpop.xlane.xlu1 %1634 }
 0x30a   :  { %v1638_v2 = vpop.xlane.xlu0 %1637 }
 0x30e   :  { %v1641_v40 = vpop.xlane.xlu0 %1640 }
 0x312   :  { %v1644_v57 = vpop.xlane.xlu1 %1643 }
 0x322   :  { %v1647_v42 = vpop.xlane.xlu0 %1646 }
 0x332   :  { %v1650_v45 = vpop.xlane.xlu1 %1649 }
 0x342   :  { %v1653_v35 = vpop.xlane.xlu0 %1652 }
 0x346   :  { %v1664_v15 = vpop.permute.xlu0 %1663 }
 0x347   :  { %v1668_v21 = vadd.f32 %v1664_v15, %v1641_v40  ;;  %v1666_v36 = vadd.f32 %v1664_v15, %v1635_v6  ;;  %v1670_v9 = vadd.f32 %v1664_v15, %v1647_v42  ;;  %v1667_v13 = vadd.f32 %v1664_v15, %v1638_v2 }
 0x348   :  { %v1672_v27 = vadd.f32 %v1664_v15, %v1653_v35  ;;  %v1669_v44 = vadd.f32 %v1664_v15, %v1644_v57  ;;  %v1671_v39 = vadd.f32 %v1664_v15, %v1650_v45 }
 0x349   :  { %1689 = vperm.xlu0 %1767, %v1668_v21   ;;  %1683 = vperm.xlu1 %1768, %v1666_v36  }
 0x34a   :  { %v1656_v53 = vpop.xlane.xlu1 %1655 }
 0x34b   :  { %v1673_v25 = vadd.f32 %v1664_v15, %v1656_v53 }
 0x34d   :  { %1695 = vperm.xlu0 %1767, %v1670_v9   ;;  %1686 = vperm.xlu1 %1768, %v1667_v13  }
 0x351   :  { %1701 = vperm.xlu0 %1767, %v1672_v27   ;;  %1692 = vperm.xlu1 %1768, %v1669_v44  }
 0x355   :  { %1698 = vperm.xlu1 %1768, %v1671_v39  }
 0x359   :  { %1704 = vperm.xlu1 %1768, %v1673_v25  }
 0x3c8   :  { %v1684_v31 = vpop.permute.xlu1 %1683  ;;  %v1690_v62 = vpop.permute.xlu0 %1689 }
 0x3c9   :  { %v1709_v12 = vrot.slane %v1684_v31, %v2691_v30  ;;  %v1717_v43 = vrot.slane %v1690_v62, %v2691_v30 }
 0x3cc   :  { %v1687_v23 = vpop.permute.xlu1 %1686  ;;  %v1696_v20 = vpop.permute.xlu0 %1695 }
 0x3cd   :  { %v1713_v29 = vrot.slane %v1687_v23, %v2691_v30  ;;  %v1725_v26 = vrot.slane %v1696_v20, %v2691_v30 }
 0x3cf   :  { %v1738_v58 = vsel %vm1597_vm2, %v1713_v29, %v1709_v12 }
 0x3d0   :  { %v1693_v7 = vpop.permute.xlu1 %1692  ;;  %v1739_v22 = vsel %vm1599_vm3, %v1717_v43, %v1738_v58  ;;  %v1702_v4 = vpop.permute.xlu0 %1701 }
 0x3d1   :  { %v1721_v19 = vrot.slane %v1693_v7, %v2691_v30  ;;  %v1733_v34 = vrot.slane %v1702_v4, %v2691_v30 }
 0x3d3   :  { %v1740_v55 = vsel %vm1601_vm4, %v1721_v19, %v1739_v22 }
 0x3d4   :  { %v1699_v49 = vpop.permute.xlu1 %1698  ;;  %v1742_v37 = vsel %vm1741_vm6, %v1725_v26, %v1740_v55 }
 0x3d5   :  { %v1729_v10 = vrot.slane %v1699_v49, %v2691_v30 }
 0x3d7   :  { %v1744_v28 = vsel %vm1743_vm7, %v1729_v10, %v1742_v37 }
 0x3d8   :  { %v1705_v38 = vpop.permute.xlu1 %1704  ;;  %v1746_v41 = vsel %vm1745_vm8, %v1733_v34, %v1744_v28 }
 0x3d9   :  { %v1737_v50 = vrot.slane %v1705_v38, %v2691_v30 }
 0x3db   :  { %v1748_v0 = vsel %vm1747_vm9, %v1737_v50, %v1746_v41 }
 0x3dc   :  { %v1751_v46 = vsel %vm1750_vm10, %v1748_v0, 0.0 }
 0x3dd   :  { %1752 = vadd.xlane.f32.xlu0 %v1751_v46 }
 0x46a   :  { %v1753_v17 = vpop.xlane.xlu0 %1752 }
 0x46b   :  { %1755 = vst.msk [vmem:[%s2872_s7] sm:$0xff] %vm1754_vm11, %v1753_v17 }
 0x46c   :  { %1760 = vsyncpa [#allocation3], 1 }

</bundles_post_ra>
